<compile_context>
chip_gen: v5e
topology: v5e:2x2
jax: 0.10.0
libtpu: 0.0.40
codegen_flags: <defaults>
</compile_context>

<pallas_src>
import math
import jax
import jax.numpy as jnp
from jax.experimental import pallas as pl
from jax.experimental.pallas import tpu as pltpu

CHARSET = " abcdefghijklmnopqrstuvwxyz,.'"
NCHAR = len(CHARSET)                  # 30
EXPAND = 1
C_ENC = 64                            # encoder conv channels
D_MODEL = 144                         # conformer hidden
N_HEADS = 4
HEAD_DIM = D_MODEL // N_HEADS         # 36
FFN_DIM = D_MODEL * 4                 # 576
N_LAYERS = 16
K_DW = 31                             # depthwise conv kernel size
FREQ = 80
W_AFTER = ((FREQ - 1) // 2 - 1) // 2  # 19
FLAT_IN = C_ENC * W_AFTER             # 1216
LN_EPS = 1e-5
BN_EPS = 1e-5
NEG_INF = -1e9
N_DEC = NCHAR * EXPAND
N_DEC_PAD = ((N_DEC + 127) // 128) * 128   # lane-dense decoder output width

# per-layer streamed parameter layout --------------------------------------
LAYER_MAT_KEYS = ('ffn1_1_w', 'ffn1_2_w', 'q_w', 'k_w', 'v_w', 'o_w',
                  'pw1a_w', 'pw1g_w', 'pw2_w', 'ffn2_1_w', 'ffn2_2_w')
VEC_D_KEYS = ('ffn1_ln_g', 'ffn1_ln_b', 'ffn1_2_b',
              'attn_ln_g', 'attn_ln_b', 'q_b', 'k_b', 'v_b', 'o_b',
              'conv_ln_g', 'conv_ln_b', 'pw1a_b', 'pw1g_b',
              'dw_b', 'bn_scale', 'bn_shift', 'pw2_b',
              'ffn2_ln_g', 'ffn2_ln_b', 'ffn2_2_b',
              'final_ln_g', 'final_ln_b')          # 22 D-sized vectors
VEC_F_KEYS = ('ffn1_1_b', 'ffn2_1_b')              # 2 FFN-sized vectors
VEC_D_IDX = {k: i for i, k in enumerate(VEC_D_KEYS)}
VEC_F_IDX = {k: i for i, k in enumerate(VEC_F_KEYS)}


def _sigmoid(z):
    return 1.0 / (1.0 + jnp.exp(-z))


# ----------------------------- Pallas kernels -----------------------------

def matmul_bias(a, w_bf16, b, act="none", tm=256):
    """out = act(a @ w + b).  a:(M,K) f32, w:(K,N) bf16, b:(N,) f32.

    Tiled over M (marked "parallel" -> megacore sharding); weights stay
    VMEM-resident (constant index_map); MXU inputs are bf16, accum in fp32.
    M is padded to a tile multiple outside (no partial blocks).
    """
    M, K = a.shape
    N = w_bf16.shape[1]
    b2 = b.reshape(1, N).astype(jnp.float32)
    tm = min(tm, max(8, ((M + 7) // 8) * 8))
    Mp = ((M + tm - 1) // tm) * tm
    a_p = a if Mp == M else jnp.pad(a, ((0, Mp - M), (0, 0)))

    def kernel(a_ref, w_ref, b_ref, o_ref):
        acc = jnp.dot(a_ref[...].astype(jnp.bfloat16), w_ref[...],
                      preferred_element_type=jnp.float32) + b_ref[...]
        if act == "relu":
            acc = jnp.maximum(acc, 0.0)
        elif act == "silu":
            acc = acc * _sigmoid(acc)
        o_ref[...] = acc

    out = pl.pallas_call(
        kernel,
        out_shape=jax.ShapeDtypeStruct((Mp, N), jnp.float32),
        grid=(Mp // tm,),
        in_specs=[pl.BlockSpec((tm, K), lambda i: (i, 0)),
                  pl.BlockSpec((K, N), lambda i: (0, 0)),
                  pl.BlockSpec((1, N), lambda i: (0, 0))],
        out_specs=pl.BlockSpec((tm, N), lambda i: (i, 0)),
        compiler_params=pltpu.CompilerParams(
            dimension_semantics=("parallel",)),
    )(a_p, w_bf16, b2)
    return out if Mp == M else out[:M]


def conformer_stack_decode(prep, feats2, mask_add, B, T):
    """Flatten projection + all 16 conformer layers + decoder log-softmax as
    ONE pallas_call.

    grid=(N_LAYERS,) ("arbitrary": sequential carry).  Per-layer weights are
    streamed by index_map (l -> (l,0,0)) and auto double-buffered against
    layer l's compute; the (M, D) activation is carried in a VMEM scratch and
    never round-trips through HBM.  The last grid step applies the decoder
    projection + log-softmax and writes a lane-dense (M, 128) output.
    """
    M = B * T
    layers = prep['layers']
    mat_arrays = [layers[k] for k in LAYER_MAT_KEYS]
    n_const = 9                     # mask, feats, flat_w/b, dec_w/b, vec_d/f, dw_w
    n_in = n_const + len(LAYER_MAT_KEYS)
    scale = 1.0 / math.sqrt(HEAD_DIM)
    pad = (K_DW - 1) // 2

    def kernel(*refs):
        (mask_ref, feats_ref, fw_ref, fb_ref,
         dec_w_ref, dec_b_ref, vd_ref, vf_ref, dw_ref) = refs[:n_const]
        mats = dict(zip(LAYER_MAT_KEYS, refs[n_const:n_in]))
        out_ref = refs[n_in]
        x_scr = refs[n_in + 1]

        l = pl.program_id(0)

        vd = vd_ref[0]                                # (22, D) f32
        vf = vf_ref[0]                                # (2, FFN) f32

        def vec(name):
            if name in VEC_F_IDX:
                i = VEC_F_IDX[name]
                return vf[i:i + 1, :]
            i = VEC_D_IDX[name]
            return vd[i:i + 1, :]

        def mat(name):
            return mats[name][0]                      # (in, out) bf16

        def mm(x, wname, bname, act=None):
            y = jnp.dot(x.astype(jnp.bfloat16), mat(wname),
                        preferred_element_type=jnp.float32) + vec(bname)
            if act == "silu":
                y = y * _sigmoid(y)
            return y

        def ln(x, gname, bname):
            mu = jnp.mean(x, axis=-1, keepdims=True)
            xc = x - mu
            var = jnp.mean(xc * xc, axis=-1, keepdims=True)
            return xc * jax.lax.rsqrt(var + LN_EPS) * vec(gname) + vec(bname)

        # layer 0 also performs the fused flatten projection (feats @ W + b).
        @pl.when(l == 0)
        def _():
            x_scr[...] = (jnp.dot(feats_ref[...].astype(jnp.bfloat16),
                                  fw_ref[...],
                                  preferred_element_type=jnp.float32)
                          + fb_ref[...])

        x = x_scr[...]                                # (M, D) f32 carry

        # ---- feed-forward module 1 (half-step residual)
        h = ln(x, 'ffn1_ln_g', 'ffn1_ln_b')
        h = mm(h, 'ffn1_1_w', 'ffn1_1_b', act="silu")
        h = mm(h, 'ffn1_2_w', 'ffn1_2_b')
        x = x + 0.5 * h

        # ---- multi-head self-attention (block-diagonal additive mask covers
        #      both batch separation and key padding in one (M, M) score)
        h = ln(x, 'attn_ln_g', 'attn_ln_b')
        q = mm(h, 'q_w', 'q_b')
        k = mm(h, 'k_w', 'k_b')
        v = mm(h, 'v_w', 'v_b')
        ow = mat('o_w')
        madd = mask_ref[...]
        ao = jnp.zeros((M, D_MODEL), jnp.float32)
        for hh in range(N_HEADS):
            c0 = hh * HEAD_DIM
            qh = q[:, c0:c0 + HEAD_DIM].astype(jnp.bfloat16)
            kh = k[:, c0:c0 + HEAD_DIM].astype(jnp.bfloat16)
            vh = v[:, c0:c0 + HEAD_DIM].astype(jnp.bfloat16)
            s = jax.lax.dot_general(qh, kh, (((1,), (1,)), ((), ())),
                                    preferred_element_type=jnp.float32) * scale
            s = s + madd
            s = s - jnp.max(s, axis=-1, keepdims=True)
            p = jnp.exp(s)
            p = p * pl.reciprocal(jnp.sum(p, axis=-1, keepdims=True),
                                  approx=True)
            pv = jnp.dot(p.astype(jnp.bfloat16), vh,
                         preferred_element_type=jnp.float32)
            # fold the concat-over-heads into the output projection
            ao = ao + jnp.dot(pv.astype(jnp.bfloat16),
                              ow[c0:c0 + HEAD_DIM, :],
                              preferred_element_type=jnp.float32)
        x = x + ao + vec('o_b')

        # ---- convolution module: GLU pointwise, depthwise, BN(eval), SiLU, pointwise
        h = ln(x, 'conv_ln_g', 'conv_ln_b')
        ha = mm(h, 'pw1a_w', 'pw1a_b')
        hg = mm(h, 'pw1g_w', 'pw1g_b')
        h = ha * _sigmoid(hg)
        wk = dw_ref[0]                                # (K, D) f32
        zpad = jnp.zeros((pad, D_MODEL), jnp.float32)
        rows = []
        for b in range(B):                            # keep batches separate
            xb = h[b * T:(b + 1) * T, :]
            xp = jnp.concatenate([zpad, xb, zpad], axis=0)
            acc = jnp.zeros((T, D_MODEL), jnp.float32)
            for kk in range(K_DW):                    # 'same' depthwise conv
                acc = acc + xp[kk:kk + T, :] * wk[kk:kk + 1, :]
            rows.append(acc)
        h = jnp.concatenate(rows, axis=0) + vec('dw_b')
        h = h * vec('bn_scale') + vec('bn_shift')     # eval-mode BatchNorm1d
        h = h * _sigmoid(h)                           # SiLU
        h = mm(h, 'pw2_w', 'pw2_b')
        x = x + h

        # ---- feed-forward module 2 (half-step residual)
        h = ln(x, 'ffn2_ln_g', 'ffn2_ln_b')
        h = mm(h, 'ffn2_1_w', 'ffn2_1_b', act="silu")
        h = mm(h, 'ffn2_2_w', 'ffn2_2_b')
        x = x + 0.5 * h

        x = ln(x, 'final_ln_g', 'final_ln_b')
        x_scr[...] = x

        # ---- fused decoder projection + log-softmax (last layer only).
        # Padding columns carry weight 0 / bias -1e30 so they don't perturb
        # the softmax of the real columns; caller slices [:, :N_DEC].
        @pl.when(l == pl.num_programs(0) - 1)
        def _():
            logits = jnp.dot(x.astype(jnp.bfloat16), dec_w_ref[...],
                             preferred_element_type=jnp.float32) + dec_b_ref[...]
            m = jnp.max(logits, axis=-1, keepdims=True)
            e = jnp.exp(logits - m)
            lse = jnp.log(jnp.sum(e, axis=-1, keepdims=True)) + m
            out_ref[...] = logits - lse

    in_specs = (
        [pl.BlockSpec((M, M), lambda l: (0, 0)),                 # mask
         pl.BlockSpec((M, FLAT_IN), lambda l: (0, 0)),           # feats
         pl.BlockSpec((FLAT_IN, D_MODEL), lambda l: (0, 0)),     # flat_w
         pl.BlockSpec((1, D_MODEL), lambda l: (0, 0)),           # flat_b
         pl.BlockSpec((D_MODEL, N_DEC_PAD), lambda l: (0, 0)),   # dec_w
         pl.BlockSpec((1, N_DEC_PAD), lambda l: (0, 0)),         # dec_b
         pl.BlockSpec((1, len(VEC_D_KEYS), D_MODEL), lambda l: (l, 0, 0)),
         pl.BlockSpec((1, len(VEC_F_KEYS), FFN_DIM), lambda l: (l, 0, 0)),
         pl.BlockSpec((1, K_DW, D_MODEL), lambda l: (l, 0, 0))]
        + [pl.BlockSpec((1,) + tuple(arr.shape[1:]), lambda l: (l, 0, 0))
           for arr in mat_arrays])

    return pl.pallas_call(
        kernel,
        out_shape=jax.ShapeDtypeStruct((M, N_DEC_PAD), jnp.float32),
        grid=(N_LAYERS,),
        in_specs=in_specs,
        out_specs=pl.BlockSpec((M, N_DEC_PAD), lambda l: (0, 0)),
        scratch_shapes=[pltpu.VMEM((M, D_MODEL), jnp.float32)],
        compiler_params=pltpu.CompilerParams(
            dimension_semantics=("arbitrary",)),
    )(mask_add, feats2, prep['flat_w'], prep['flat_b'],
      prep['dec_w'], prep['dec_b'],
      layers['vec_d'], layers['vec_f'], layers['dw_w'], *mat_arrays)


# ----------------------------- model glue -----------------------------

def conv2d_relu(x_nchw, w_flat_bf16, b, kh, kw, stride):
    """NCHW conv via im2col + M-tiled Pallas matmul (+ bias + ReLU)."""
    B, C, Hh, W = x_nchw.shape
    Ho = (Hh - kh) // stride + 1
    Wo = (W - kw) // stride + 1
    cols = []
    for i in range(kh):
        for j in range(kw):
            cols.append(x_nchw[:, :, i:i + stride * (Ho - 1) + 1:stride,
                               j:j + stride * (Wo - 1) + 1:stride])
    patches = jnp.stack(cols, axis=2)                       # (B, C, kh*kw, Ho, Wo)
    patches = patches.transpose(0, 3, 4, 1, 2).reshape(B * Ho * Wo, C * kh * kw)
    out = matmul_bias(patches, w_flat_bf16, b, act="relu")  # (B*Ho*Wo, Cout)
    Cout = w_flat_bf16.shape[1]
    return out.reshape(B, Ho, Wo, Cout).transpose(0, 3, 1, 2)


def encode_fn(prep, x):
    """x: (B, time, freq=80) -> (B, T2, C*19)."""
    B = x.shape[0]
    xc = x[:, None]                                         # (B,1,T,80)
    h = conv2d_relu(xc, prep['conv1_w'], prep['conv1_b'], 3, 3, 2)
    h = conv2d_relu(h, prep['conv2_w'], prep['conv2_b'], 3, 3, 2)
    h = h.transpose(0, 2, 1, 3)                             # (B, T2, C, 19)
    return h.reshape(B, h.shape[1], -1)                     # (B, T2, 1216)


def build_attn_mask(lengths, B, T):
    """Block-diagonal additive mask (M, M): 0 where query and key are in the
    same batch element AND the key index is within that element's length."""
    pos = jnp.arange(T, dtype=jnp.int32)
    key_valid = pos[None, :] < lengths[:, None]             # (B, T)
    same_batch = jnp.eye(B, dtype=jnp.bool_)                # (Bq, Bk)
    ok = same_batch[:, :, None] & key_valid[None, :, :]     # (Bq, Bk, Tk)
    ok = jnp.broadcast_to(ok[:, None, :, :], (B, T, B, T))  # (Bq, Tq, Bk, Tk)
    return jnp.where(ok.reshape(B * T, B * T), 0.0, NEG_INF).astype(jnp.float32)


def body_fn(prep, feats, lengths):
    """feats: (B, T, 1216) already sliced to max length; lengths: (B,) int."""
    B, T, _ = feats.shape
    M = B * T
    feats2 = feats.reshape(M, FLAT_IN)
    mask_add = build_attn_mask(lengths, B, T)
    logp_pad = conformer_stack_decode(prep, feats2, mask_add, B, T)  # (M, 128)
    logp = logp_pad[:, :N_DEC].reshape(B, T, N_DEC)
    logp = logp.reshape(B, T * EXPAND, NCHAR)
    return logp.transpose(1, 0, 2)                           # (T*expand, B, 30)


_encode_jit = jax.jit(encode_fn)
_body_jit = jax.jit(body_fn)


def rec_forward(prep, x, y_raw):
    y = (y_raw >> 2) - 1                     # lengths in encoded frames
    # NOTE: the reference slices to exactly max(y) before the conformer, so the
    # depthwise-conv receptive field never sees extra padded frames.  Bucketing
    # T would change boundary frames, so the exact slice is kept; the host
    # sync / per-tmax recompile is the price of matching the PyTorch semantics.
    tmax = int(jax.device_get(jnp.max(y)))
    feats = _encode_jit(prep, x)
    feats = feats[:, :tmax]                  # x = x[:, :max(y)]
    logp = _body_jit(prep, feats, y)
    zz = y * 4
    return logp, zz


# ----------------------------- parameters -----------------------------

def init_params(key):
    keys = iter(jax.random.split(key, 64))

    def lin(kk, fi, fo):
        w = jax.random.normal(kk, (fi, fo), jnp.float32) * (1.0 / math.sqrt(fi))
        return w, jnp.zeros((fo,), jnp.float32)

    p = {}
    p['conv1_w'], p['conv1_b'] = lin(next(keys), 1 * 3 * 3, C_ENC)
    p['conv2_w'], p['conv2_b'] = lin(next(keys), C_ENC * 3 * 3, C_ENC)
    p['flat_w'], p['flat_b'] = lin(next(keys), FLAT_IN, D_MODEL)

    def layer_params(kk):
        it = iter(jax.random.split(kk, 32))
        lp = {}

        def add_lin(name, fi, fo):
            w, b = lin(next(it), fi, fo)
            lp[name + '_w'] = w
            lp[name + '_b'] = b

        def add_ln(name):
            lp[name + '_g'] = jnp.ones((D_MODEL,), jnp.float32)
            lp[name + '_b'] = jnp.zeros((D_MODEL,), jnp.float32)

        add_ln('ffn1_ln'); add_lin('ffn1_1', D_MODEL, FFN_DIM); add_lin('ffn1_2', FFN_DIM, D_MODEL)
        add_ln('attn_ln')
        add_lin('q', D_MODEL, D_MODEL); add_lin('k', D_MODEL, D_MODEL)
        add_lin('v', D_MODEL, D_MODEL); add_lin('o', D_MODEL, D_MODEL)
        add_ln('conv_ln')
        add_lin('pw1a', D_MODEL, D_MODEL); add_lin('pw1g', D_MODEL, D_MODEL)
        lp['dw_w'] = jax.random.normal(next(it), (K_DW, D_MODEL), jnp.float32) * (1.0 / math.sqrt(K_DW))
        lp['dw_b'] = jnp.zeros((D_MODEL,), jnp.float32)
        # eval-mode BatchNorm1d with running_mean=0, running_var=1, gamma=1, beta=0
        lp['bn_scale'] = jnp.full((D_MODEL,), 1.0 / math.sqrt(1.0 + BN_EPS), jnp.float32)
        lp['bn_shift'] = jnp.zeros((D_MODEL,), jnp.float32)
        add_lin('pw2', D_MODEL, D_MODEL)
        add_ln('ffn2_ln'); add_lin('ffn2_1', D_MODEL, FFN_DIM); add_lin('ffn2_2', FFN_DIM, D_MODEL)
        add_ln('final_ln')
        return lp

    lps = [layer_params(k) for k in jax.random.split(next(keys), N_LAYERS)]
    p['layers'] = jax.tree_util.tree_map(lambda *xs: jnp.stack(xs, 0), *lps)
    p['dec_w'], p['dec_b'] = lin(next(keys), D_MODEL, NCHAR * EXPAND)
    return p


def prepare_params(p):
    """Convert fp32 'torch-like' params to the kernel layout:
    - matmul weights -> bf16 (halves streamed weight HBM traffic, native MXU)
    - per-layer D/FFN-sized vectors packed into (L, 22, D) / (L, 2, FFN)
    - decoder padded to a lane-dense 128-wide output (pad bias = -1e30)."""
    prep = {
        'conv1_w': p['conv1_w'].astype(jnp.bfloat16), 'conv1_b': p['conv1_b'],
        'conv2_w': p['conv2_w'].astype(jnp.bfloat16), 'conv2_b': p['conv2_b'],
        'flat_w': p['flat_w'].astype(jnp.bfloat16),
        'flat_b': p['flat_b'].reshape(1, D_MODEL),
    }
    lay = {k: p['layers'][k].astype(jnp.bfloat16) for k in LAYER_MAT_KEYS}
    lay['dw_w'] = p['layers']['dw_w']                         # (L, K, D) f32 (VPU math)
    lay['vec_d'] = jnp.stack([p['layers'][k] for k in VEC_D_KEYS], axis=1)
    lay['vec_f'] = jnp.stack([p['layers'][k] for k in VEC_F_KEYS], axis=1)
    prep['layers'] = lay

    dec_w = jnp.zeros((D_MODEL, N_DEC_PAD), jnp.float32).at[:, :N_DEC].set(p['dec_w'])
    dec_b = jnp.full((1, N_DEC_PAD), -1e30, jnp.float32).at[0, :N_DEC].set(p['dec_b'])
    prep['dec_w'] = dec_w.astype(jnp.bfloat16)
    prep['dec_b'] = dec_b
    return prep


# ----------------------------- main -----------------------------

if __name__ == "__main__":
    key = jax.random.PRNGKey(0)
    k_param, k_x = jax.random.split(key)

    params = init_params(k_param)
    prep = prepare_params(params)

    B, T_IN = 2, 64                           # time=64 -> encoded T2 = 15
    x = jax.random.normal(k_x, (B, T_IN, FREQ), jnp.float32)
    y = jnp.array([64, 48], dtype=jnp.int32)  # raw lengths; (y>>2)-1 = [15, 11]

    logp, zz = rec_forward(prep, x, y)
    jax.block_until_ready(logp)
    jax.block_until_ready(zz)

    # logp: (T*expand, B, 30) log-probabilities; zz: scaled lengths
    assert logp.shape == (15 * EXPAND, B, NCHAR), logp.shape
    assert zz.shape == (B,)
    assert bool(jnp.all(jnp.isfinite(logp)))
    print("KERNEL_OK")
</pallas_src>

<mosaic_0001>
module attributes {stable_mosaic.version = 11 : i64} {
  func.func @kernel(%arg0: i32, %arg1: memref<256x9xf32, #tpu.memory_space<vmem>>, %arg2: memref<9x64xbf16, #tpu.memory_space<vmem>>, %arg3: memref<1x64xf32, #tpu.memory_space<vmem>>, %arg4: memref<256x64xf32, #tpu.memory_space<vmem>>) attributes {dimension_semantics = [#tpu.dimension_semantics<parallel>], iteration_bounds = array<i64: 10>, scalar_prefetch = 0 : i64, scratch_operands = 0 : i64, tpu.core_type = #tpu.core_type<tc>, window_params = [{transform_indices = @transform_0, window_bounds = array<i64: 256, 9>}, {pipeline_mode = #tpu.pipeline_mode<synchronous>, transform_indices = @transform_1, window_bounds = array<i64: 9, 64>}, {pipeline_mode = #tpu.pipeline_mode<synchronous>, transform_indices = @transform_2, window_bounds = array<i64: 1, 64>}, {transform_indices = @transform_3, window_bounds = array<i64: 256, 64>}]} {
    %c0 = arith.constant 0 : index
    %c0_0 = arith.constant 0 : index
    %0 = vector.load %arg1[%c0, %c0_0] : memref<256x9xf32, #tpu.memory_space<vmem>>, vector<256x9xf32>
    %1 = arith.truncf %0 : vector<256x9xf32> to vector<256x9xbf16>
    %c0_1 = arith.constant 0 : index
    %c0_2 = arith.constant 0 : index
    %2 = vector.load %arg2[%c0_1, %c0_2] : memref<9x64xbf16, #tpu.memory_space<vmem>>, vector<9x64xbf16>
    %cst = arith.constant dense<0.000000e+00> : vector<256x64xf32>
    %3 = tpu.matmul %1, %2, %cst {dimension_numbers = #tpu.dot_dimension_numbers<[1], [0], [0], [1], [0, 0, 1, 1], [], []>} : vector<256x9xbf16>, vector<9x64xbf16>, vector<256x64xf32> -> vector<256x64xf32>
    %c0_3 = arith.constant 0 : index
    %c0_4 = arith.constant 0 : index
    %4 = vector.load %arg3[%c0_3, %c0_4] : memref<1x64xf32, #tpu.memory_space<vmem>>, vector<1x64xf32>
    %5 = vector.broadcast %4 : vector<1x64xf32> to vector<256x64xf32>
    %6 = arith.addf %3, %5 : vector<256x64xf32>
    %cst_5 = arith.constant 0.000000e+00 : f32
    %7 = vector.broadcast %cst_5 : f32 to vector<256x64xf32>
    %8 = arith.maximumf %6, %7 : vector<256x64xf32>
    %c0_6 = arith.constant 0 : index
    %c0_7 = arith.constant 0 : index
    %9 = vector.load %arg4[%c0_6, %c0_7] : memref<256x64xf32, #tpu.memory_space<vmem>>, vector<256x64xf32>
    tpu.vector_store %arg4[%c0_6, %c0_7], %8 {strides = array<i32>} : memref<256x64xf32, #tpu.memory_space<vmem>>, vector<256x64xf32>,
    return
  }
  func.func @transform_0(%arg0: i32) -> (i32, i32) {
    %c0_i32 = arith.constant 0 : i32
    %c0_i32_0 = arith.constant 0 : i32
    return %arg0, %c0_i32 : i32, i32
  }
  func.func @transform_1(%arg0: i32) -> (i32, i32) {
    %c0_i32 = arith.constant 0 : i32
    %c0_i32_0 = arith.constant 0 : i32
    %c0_i32_1 = arith.constant 0 : i32
    return %c0_i32, %c0_i32_0 : i32, i32
  }
  func.func @transform_2(%arg0: i32) -> (i32, i32) {
    %c0_i32 = arith.constant 0 : i32
    %c0_i32_0 = arith.constant 0 : i32
    %c0_i32_1 = arith.constant 0 : i32
    return %c0_i32, %c0_i32_0 : i32, i32
  }
  func.func @transform_3(%arg0: i32) -> (i32, i32) {
    %c0_i32 = arith.constant 0 : i32
    %c0_i32_0 = arith.constant 0 : i32
    return %arg0, %c0_i32 : i32, i32
  }
}

module attributes {stable_mosaic.version = 11 : i64} {
  func.func @kernel(%arg0: i32, %arg1: memref<256x576xf32, #tpu.memory_space<vmem>>, %arg2: memref<576x64xbf16, #tpu.memory_space<vmem>>, %arg3: memref<1x64xf32, #tpu.memory_space<vmem>>, %arg4: memref<256x64xf32, #tpu.memory_space<vmem>>) attributes {dimension_semantics = [#tpu.dimension_semantics<parallel>], iteration_bounds = array<i64: 3>, scalar_prefetch = 0 : i64, scratch_operands = 0 : i64, tpu.core_type = #tpu.core_type<tc>, window_params = [{transform_indices = @transform_0, window_bounds = array<i64: 256, 576>}, {pipeline_mode = #tpu.pipeline_mode<synchronous>, transform_indices = @transform_1, window_bounds = array<i64: 576, 64>}, {pipeline_mode = #tpu.pipeline_mode<synchronous>, transform_indices = @transform_2, window_bounds = array<i64: 1, 64>}, {transform_indices = @transform_3, window_bounds = array<i64: 256, 64>}]} {
    %c0 = arith.constant 0 : index
    %c0_0 = arith.constant 0 : index
    %0 = vector.load %arg1[%c0, %c0_0] : memref<256x576xf32, #tpu.memory_space<vmem>>, vector<256x576xf32>
    %1 = arith.truncf %0 : vector<256x576xf32> to vector<256x576xbf16>
    %c0_1 = arith.constant 0 : index
    %c0_2 = arith.constant 0 : index
    %2 = vector.load %arg2[%c0_1, %c0_2] : memref<576x64xbf16, #tpu.memory_space<vmem>>, vector<576x64xbf16>
    %cst = arith.constant dense<0.000000e+00> : vector<256x64xf32>
    %3 = tpu.matmul %1, %2, %cst {dimension_numbers = #tpu.dot_dimension_numbers<[1], [0], [0], [1], [0, 0, 1, 1], [], []>} : vector<256x576xbf16>, vector<576x64xbf16>, vector<256x64xf32> -> vector<256x64xf32>
    %c0_3 = arith.constant 0 : index
    %c0_4 = arith.constant 0 : index
    %4 = vector.load %arg3[%c0_3, %c0_4] : memref<1x64xf32, #tpu.memory_space<vmem>>, vector<1x64xf32>
    %5 = vector.broadcast %4 : vector<1x64xf32> to vector<256x64xf32>
    %6 = arith.addf %3, %5 : vector<256x64xf32>
    %cst_5 = arith.constant 0.000000e+00 : f32
    %7 = vector.broadcast %cst_5 : f32 to vector<256x64xf32>
    %8 = arith.maximumf %6, %7 : vector<256x64xf32>
    %c0_6 = arith.constant 0 : index
    %c0_7 = arith.constant 0 : index
    %9 = vector.load %arg4[%c0_6, %c0_7] : memref<256x64xf32, #tpu.memory_space<vmem>>, vector<256x64xf32>
    tpu.vector_store %arg4[%c0_6, %c0_7], %8 {strides = array<i32>} : memref<256x64xf32, #tpu.memory_space<vmem>>, vector<256x64xf32>,
    return
  }
  func.func @transform_0(%arg0: i32) -> (i32, i32) {
    %c0_i32 = arith.constant 0 : i32
    %c0_i32_0 = arith.constant 0 : i32
    return %arg0, %c0_i32 : i32, i32
  }
  func.func @transform_1(%arg0: i32) -> (i32, i32) {
    %c0_i32 = arith.constant 0 : i32
    %c0_i32_0 = arith.constant 0 : i32
    %c0_i32_1 = arith.constant 0 : i32
    return %c0_i32, %c0_i32_0 : i32, i32
  }
  func.func @transform_2(%arg0: i32) -> (i32, i32) {
    %c0_i32 = arith.constant 0 : i32
    %c0_i32_0 = arith.constant 0 : i32
    %c0_i32_1 = arith.constant 0 : i32
    return %c0_i32, %c0_i32_0 : i32, i32
  }
  func.func @transform_3(%arg0: i32) -> (i32, i32) {
    %c0_i32 = arith.constant 0 : i32
    %c0_i32_0 = arith.constant 0 : i32
    return %arg0, %c0_i32 : i32, i32
  }
}

</mosaic_0001>

<bundles_post_ra>
// kernel: encode_fn.2
= control target key start
LH: loop header
LB: loop body
LE: loop exit
PB: predicated region body
PF: predicated region fallthrough
CT: control target
= control target key end

     0   :  { %s574_s12 = smov 0   ;;  %s757_s0 = inlined_call_operand.vmem [shape: f32[2560,9], index: 0, kind: input, shape index: {}]   ;;  %s758_s1 = inlined_call_operand.vmem [shape: bf16[9,64], index: 1, kind: input, shape index: {}]   ;;  %s759_s2 = inlined_call_operand.vmem [shape: f32[1,64], index: 2, kind: input, shape index: {}]   ;;  %s760_s3 = inlined_call_operand.vmem [shape: f32[2560,64], index: 3, kind: output, shape index: {}]  }
   0x1 LB: > { %s500_s13 = sadd.s32 4294967295, %s551_s12   ;;  %p504_p0 = scmp.ge.s32.totalorder %s551_s12, 1  ;;  %s551_s12 = sphi %s574_s12, %s13_s12  }
   0x2   : > { %p138_p1 = scmp.lt.s32.totalorder %s551_s12, 11 }
   0x4   : > { %p139_p2 = pnand %p504_p0, %p138_p1 }
   0x5   : > { %s505_s18 = sshll.u32 (!%p139_p2), %s500_s13, 5 }
   0x6   : > { %142 = sbr.rel (%p139_p2) target bundleno = 215 (0xd7), region = 32  ;;  %p163_p3 = scmp.lt.s32.totalorder (!%p139_p2), %s505_s18, 319 }
   0xb   : > { %v511_v0 = vld [vmem:[%s758_s1] sm:$0xf]  ;;  %v531_v1 = vld [vmem:[%s758_s1] sm:$0x10]  ;;  %vm283_vm0 = vcmask 1043456   ;;  %vm284_vm1 = vcmask 1044480  }
   0xc   : > { %v512_v2 = vor.u32 %v531_v1, %v511_v0  ;;  %v553_v3 = vmov 65535   ;;  %s762_s18 = smov (!%p163_p3, %s505_s18), 319  ;;  %vm234_vm2 = vcmask 72704   ;;  %v649_v55 = vld [vmem:[%s759_s2] ss:$0 sm:$0xff]  ;;  %vm411_vm3 = vcmask 523264  }
   0xd   : > { %v285_v4 = vsel %vm283_vm0, 4294967295, %v553_v3  ;;  %s506_s19 = sshll.u32 %s762_s18, 3 }
   0xe   : > { %v286_v5 = vsel %vm284_vm1, %v285_v4, 0  ;;  %s596_s22 = scalar_lea.vmem %s757_s0, %s506_s19  ;;  %s657_s27 = scalar_lea.vmem %s760_s3, %s506_s19 }
   0xf   : > { %v288_v6 = vand.u32 %v512_v2, %v286_v5  ;;  %v175_v7 = vld [vmem:[%s596_s22] sm:$0xff]  ;;  %v176_v8 = vld [vmem:[%s596_s22 + $0x8] sm:$0xff]  ;;  %v177_v19 = vld [vmem:[%s596_s22 + $0x10] sm:$0xff] }
  0x10   : > { %v183_v9 = vld [vmem:[%s596_s22 + $0x40] sm:$0xff]  ;;  %v207_v10 = vpack.c.bf16 %v176_v8, %v175_v7  ;;  %v184_v11 = vld [vmem:[%s596_s22 + $0x48] sm:$0xff]  ;;  %v178_v20 = vld [vmem:[%s596_s22 + $0x18] sm:$0xff] }
  0x11   : > { %297 = vmatpush.bf16.msra.mxu0 %v288_v6  ;;  %532 = vmatpush.bf16.msra.mxu1 %v288_v6  ;;  %v191_v12 = vld [vmem:[%s596_s22 + $0x80] sm:$0xff]  ;;  %v192_v13 = vld [vmem:[%s596_s22 + $0x88] sm:$0xff]  ;;  %v211_v14 = vpack.c.bf16 %v184_v11, %v183_v9  ;;  %v185_v21 = vld [vmem:[%s596_s22 + $0x50] sm:$0xff]  ;;  %v208_v27 = vpack.c.bf16 %v178_v20, %v177_v19 }
  0x12   : > { %533 = vmatpush.bf16.msra.mxu2 %v288_v6  ;;  %534 = vmatpush.bf16.msra.mxu3 %v288_v6  ;;  %v215_v15 = vpack.c.bf16 %v192_v13, %v191_v12  ;;  %v199_v16 = vld [vmem:[%s596_s22 + $0xc0] sm:$0xff]  ;;  %v200_v17 = vld [vmem:[%s596_s22 + $0xc8] sm:$0xff]  ;;  %v186_v22 = vld [vmem:[%s596_s22 + $0x58] sm:$0xff] }
  0x13   : > { %v219_v18 = vpack.c.bf16 %v200_v17, %v199_v16  ;;  %v193_v23 = vld [vmem:[%s596_s22 + $0x90] sm:$0xff]  ;;  %v194_v24 = vld [vmem:[%s596_s22 + $0x98] sm:$0xff]  ;;  %v212_v28 = vpack.c.bf16 %v186_v22, %v185_v21  ;;  %v179_v31 = vld [vmem:[%s596_s22 + $0x20] sm:$0xff] }
  0x14   : > { %513 = vmatmul.msk.bf16.vlgmr.msra.gmra.mxu0 %vm234_vm2, %v207_v10  ;;  %517 = vmatmul.msk.bf16.vlgmr.msra.gmra.mxu1 %vm234_vm2, %v211_v14  ;;  %v201_v25 = vld [vmem:[%s596_s22 + $0xd0] sm:$0xff]  ;;  %v202_v26 = vld [vmem:[%s596_s22 + $0xd8] sm:$0xff]  ;;  %v216_v29 = vpack.c.bf16 %v194_v24, %v193_v23  ;;  %v180_v32 = vld [vmem:[%s596_s22 + $0x28] sm:$0xff] }
  0x15   : > { %521 = vmatmul.msk.bf16.vlgmr.msra.gmra.mxu2 %vm234_vm2, %v215_v15  ;;  %525 = vmatmul.msk.bf16.vlgmr.msra.gmra.mxu3 %vm234_vm2, %v219_v18  ;;  %v220_v30 = vpack.c.bf16 %v202_v26, %v201_v25  ;;  %v187_v33 = vld [vmem:[%s596_s22 + $0x60] sm:$0xff]  ;;  %v188_v34 = vld [vmem:[%s596_s22 + $0x68] sm:$0xff]  ;;  %v209_v39 = vpack.c.bf16 %v180_v32, %v179_v31  ;;  %v181_v43 = vld [vmem:[%s596_s22 + $0x30] sm:$0xff] }
  0x16   : > { %v195_v35 = vld [vmem:[%s596_s22 + $0xa0] sm:$0xff]  ;;  %v196_v36 = vld [vmem:[%s596_s22 + $0xa8] sm:$0xff]  ;;  %v213_v40 = vpack.c.bf16 %v188_v34, %v187_v33  ;;  %v182_v44 = vld [vmem:[%s596_s22 + $0x38] sm:$0xff] }
  0x17   : > { %v203_v37 = vld [vmem:[%s596_s22 + $0xe0] sm:$0xff]  ;;  %v204_v38 = vld [vmem:[%s596_s22 + $0xe8] sm:$0xff]  ;;  %v217_v41 = vpack.c.bf16 %v196_v36, %v195_v35  ;;  %v189_v45 = vld [vmem:[%s596_s22 + $0x70] sm:$0xff]  ;;  %v210_v51 = vpack.c.bf16 %v182_v44, %v181_v43 }
  0x18   : > { %v221_v42 = vpack.c.bf16 %v204_v38, %v203_v37  ;;  %v190_v46 = vld [vmem:[%s596_s22 + $0x78] sm:$0xff]  ;;  %v197_v47 = vld [vmem:[%s596_s22 + $0xb0] sm:$0xff] }
  0x19   : > { %v198_v48 = vld [vmem:[%s596_s22 + $0xb8] sm:$0xff]  ;;  %v205_v49 = vld [vmem:[%s596_s22 + $0xf0] sm:$0xff]  ;;  %v214_v52 = vpack.c.bf16 %v190_v46, %v189_v45 }
  0x1a   : > { %v206_v50 = vld [vmem:[%s596_s22 + $0xf8] sm:$0xff]  ;;  %v218_v53 = vpack.c.bf16 %v198_v48, %v197_v47 }
  0x1b   : > { %v222_v54 = vpack.c.bf16 %v206_v50, %v205_v49 }
  0x24   : > { %514 = vmatmul.msk.bf16.gmra.mxu0 %vm234_vm2, %v208_v27  ;;  %518 = vmatmul.msk.bf16.gmra.mxu1 %vm234_vm2, %v212_v28 }
  0x25   : > { %522 = vmatmul.msk.bf16.gmra.mxu2 %vm234_vm2, %v216_v29  ;;  %526 = vmatmul.msk.bf16.gmra.mxu3 %vm234_vm2, %v220_v30 }
  0x34   : > { %515 = vmatmul.msk.bf16.gmra.mxu0 %vm234_vm2, %v209_v39  ;;  %519 = vmatmul.msk.bf16.gmra.mxu1 %vm234_vm2, %v213_v40 }
  0x35   : > { %523 = vmatmul.msk.bf16.gmra.mxu2 %vm234_vm2, %v217_v41  ;;  %527 = vmatmul.msk.bf16.gmra.mxu3 %vm234_vm2, %v221_v42 }
  0x44   : > { %516 = vmatmul.msk.bf16.gmra.mxu0 %vm234_vm2, %v210_v51  ;;  %520 = vmatmul.msk.bf16.gmra.mxu1 %vm234_vm2, %v214_v52 }
  0x45   : > { %524 = vmatmul.msk.bf16.gmra.mxu2 %vm234_vm2, %v218_v53  ;;  %528 = vmatmul.msk.bf16.gmra.mxu3 %vm234_vm2, %v222_v54 }
  0x91   : > { %v299_v56 = vpop.f32.mrf.mxu0  ;;  %v319_v58 = vpop.f32.mrf.mxu1 }
  0x92   : > { %v300_v57 = vadd.f32 %v649_v55, %v299_v56  ;;  %v320_v59 = vadd.f32 %v649_v55, %v319_v58 }
  0x94   : > { %v379_v60 = vmax.f32 %v300_v57, 0.0  ;;  %v387_v61 = vmax.f32 %v320_v59, 0.0 }
  0x96   : > { %412 = vst.msk [vmem:[%s657_s27] sm:$0xff] %vm411_vm3, %v379_v60 }
  0x97   : > { %420 = vst.msk [vmem:[%s657_s27 + $0x40] sm:$0xff] %vm411_vm3, %v387_v61 }
  0x98   : > { %v339_v62 = vpop.f32.mrf.mxu2  ;;  %v359_v0 = vpop.f32.mrf.mxu3 }
  0x99   : > { %v340_v63 = vadd.f32 %v649_v55, %v339_v62  ;;  %v301_v1 = vpop.f32.mrf.mxu0  ;;  %v360_v2 = vadd.f32 %v649_v55, %v359_v0  ;;  %v321_v4 = vpop.f32.mrf.mxu1 }
  0x9a   : > { %v302_v3 = vadd.f32 %v649_v55, %v301_v1  ;;  %v322_v6 = vadd.f32 %v649_v55, %v321_v4 }
  0x9b   : > { %v395_v5 = vmax.f32 %v340_v63, 0.0  ;;  %v403_v7 = vmax.f32 %v360_v2, 0.0 }
  0x9c   : > { %v380_v8 = vmax.f32 %v302_v3, 0.0  ;;  %v388_v9 = vmax.f32 %v322_v6, 0.0 }
  0x9d   : > { %428 = vst.msk [vmem:[%s657_s27 + $0x80] sm:$0xff] %vm411_vm3, %v395_v5 }
  0x9e   : > { %436 = vst.msk [vmem:[%s657_s27 + $0xc0] sm:$0xff] %vm411_vm3, %v403_v7 }
  0x9f   : > { %413 = vst.msk [vmem:[%s657_s27 + $0x8] sm:$0xff] %vm411_vm3, %v380_v8 }
  0xa0   : > { %421 = vst.msk [vmem:[%s657_s27 + $0x48] sm:$0xff] %vm411_vm3, %v388_v9  ;;  %v341_v10 = vpop.f32.mrf.mxu2  ;;  %v361_v12 = vpop.f32.mrf.mxu3 }
  0xa1   : > { %v342_v11 = vadd.f32 %v649_v55, %v341_v10  ;;  %v304_v13 = vpop.f32.mrf.mxu0  ;;  %v362_v14 = vadd.f32 %v649_v55, %v361_v12  ;;  %v324_v16 = vpop.f32.mrf.mxu1 }
  0xa2   : > { %v305_v15 = vadd.f32 %v649_v55, %v304_v13  ;;  %v325_v18 = vadd.f32 %v649_v55, %v324_v16 }
  0xa3   : > { %v396_v17 = vmax.f32 %v342_v11, 0.0  ;;  %v404_v19 = vmax.f32 %v362_v14, 0.0 }
  0xa4   : > { %v381_v20 = vmax.f32 %v305_v15, 0.0  ;;  %v389_v21 = vmax.f32 %v325_v18, 0.0 }
  0xa5   : > { %429 = vst.msk [vmem:[%s657_s27 + $0x88] sm:$0xff] %vm411_vm3, %v396_v17 }
  0xa6   : > { %437 = vst.msk [vmem:[%s657_s27 + $0xc8] sm:$0xff] %vm411_vm3, %v404_v19 }
  0xa7   : > { %414 = vst.msk [vmem:[%s657_s27 + $0x10] sm:$0xff] %vm411_vm3, %v381_v20 }
  0xa8   : > { %422 = vst.msk [vmem:[%s657_s27 + $0x50] sm:$0xff] %vm411_vm3, %v389_v21  ;;  %v344_v22 = vpop.f32.mrf.mxu2  ;;  %v364_v24 = vpop.f32.mrf.mxu3 }
  0xa9   : > { %v345_v23 = vadd.f32 %v649_v55, %v344_v22  ;;  %v306_v25 = vpop.f32.mrf.mxu0  ;;  %v365_v26 = vadd.f32 %v649_v55, %v364_v24  ;;  %v326_v28 = vpop.f32.mrf.mxu1 }
  0xaa   : > { %v307_v27 = vadd.f32 %v649_v55, %v306_v25  ;;  %v327_v30 = vadd.f32 %v649_v55, %v326_v28 }
  0xab   : > { %v397_v29 = vmax.f32 %v345_v23, 0.0  ;;  %v405_v31 = vmax.f32 %v365_v26, 0.0 }
  0xac   : > { %v382_v32 = vmax.f32 %v307_v27, 0.0  ;;  %v390_v33 = vmax.f32 %v327_v30, 0.0 }
  0xad   : > { %430 = vst.msk [vmem:[%s657_s27 + $0x90] sm:$0xff] %vm411_vm3, %v397_v29 }
  0xae   : > { %438 = vst.msk [vmem:[%s657_s27 + $0xd0] sm:$0xff] %vm411_vm3, %v405_v31 }
  0xaf   : > { %415 = vst.msk [vmem:[%s657_s27 + $0x18] sm:$0xff] %vm411_vm3, %v382_v32 }
  0xb0   : > { %423 = vst.msk [vmem:[%s657_s27 + $0x58] sm:$0xff] %vm411_vm3, %v390_v33  ;;  %v346_v34 = vpop.f32.mrf.mxu2  ;;  %v366_v36 = vpop.f32.mrf.mxu3 }
  0xb1   : > { %v347_v35 = vadd.f32 %v649_v55, %v346_v34  ;;  %v309_v37 = vpop.f32.mrf.mxu0  ;;  %v367_v38 = vadd.f32 %v649_v55, %v366_v36  ;;  %v329_v40 = vpop.f32.mrf.mxu1 }
  0xb2   : > { %v310_v39 = vadd.f32 %v649_v55, %v309_v37  ;;  %v330_v42 = vadd.f32 %v649_v55, %v329_v40 }
  0xb3   : > { %v398_v41 = vmax.f32 %v347_v35, 0.0  ;;  %v406_v43 = vmax.f32 %v367_v38, 0.0 }
  0xb4   : > { %v383_v44 = vmax.f32 %v310_v39, 0.0  ;;  %v391_v45 = vmax.f32 %v330_v42, 0.0 }
  0xb5   : > { %431 = vst.msk [vmem:[%s657_s27 + $0x98] sm:$0xff] %vm411_vm3, %v398_v41 }
  0xb6   : > { %439 = vst.msk [vmem:[%s657_s27 + $0xd8] sm:$0xff] %vm411_vm3, %v406_v43 }
  0xb7   : > { %416 = vst.msk [vmem:[%s657_s27 + $0x20] sm:$0xff] %vm411_vm3, %v383_v44 }
  0xb8   : > { %424 = vst.msk [vmem:[%s657_s27 + $0x60] sm:$0xff] %vm411_vm3, %v391_v45  ;;  %v349_v46 = vpop.f32.mrf.mxu2  ;;  %v369_v48 = vpop.f32.mrf.mxu3 }
  0xb9   : > { %v350_v47 = vadd.f32 %v649_v55, %v349_v46  ;;  %v311_v49 = vpop.f32.mrf.mxu0  ;;  %v370_v50 = vadd.f32 %v649_v55, %v369_v48  ;;  %v331_v52 = vpop.f32.mrf.mxu1 }
  0xba   : > { %v312_v51 = vadd.f32 %v649_v55, %v311_v49  ;;  %v332_v54 = vadd.f32 %v649_v55, %v331_v52 }
  0xbb   : > { %v399_v53 = vmax.f32 %v350_v47, 0.0  ;;  %v407_v56 = vmax.f32 %v370_v50, 0.0 }
  0xbc   : > { %v384_v57 = vmax.f32 %v312_v51, 0.0  ;;  %v392_v58 = vmax.f32 %v332_v54, 0.0 }
  0xbd   : > { %432 = vst.msk [vmem:[%s657_s27 + $0xa0] sm:$0xff] %vm411_vm3, %v399_v53 }
  0xbe   : > { %440 = vst.msk [vmem:[%s657_s27 + $0xe0] sm:$0xff] %vm411_vm3, %v407_v56 }
  0xbf   : > { %417 = vst.msk [vmem:[%s657_s27 + $0x28] sm:$0xff] %vm411_vm3, %v384_v57 }
  0xc0   : > { %425 = vst.msk [vmem:[%s657_s27 + $0x68] sm:$0xff] %vm411_vm3, %v392_v58  ;;  %v351_v59 = vpop.f32.mrf.mxu2  ;;  %v371_v61 = vpop.f32.mrf.mxu3 }
  0xc1   : > { %v352_v60 = vadd.f32 %v649_v55, %v351_v59  ;;  %v314_v62 = vpop.f32.mrf.mxu0  ;;  %v372_v63 = vadd.f32 %v649_v55, %v371_v61  ;;  %v334_v1 = vpop.f32.mrf.mxu1 }
  0xc2   : > { %v315_v0 = vadd.f32 %v649_v55, %v314_v62  ;;  %v335_v3 = vadd.f32 %v649_v55, %v334_v1 }
  0xc3   : > { %v400_v2 = vmax.f32 %v352_v60, 0.0  ;;  %v408_v4 = vmax.f32 %v372_v63, 0.0 }
  0xc4   : > { %v385_v5 = vmax.f32 %v315_v0, 0.0  ;;  %v393_v6 = vmax.f32 %v335_v3, 0.0 }
  0xc5   : > { %433 = vst.msk [vmem:[%s657_s27 + $0xa8] sm:$0xff] %vm411_vm3, %v400_v2 }
  0xc6   : > { %441 = vst.msk [vmem:[%s657_s27 + $0xe8] sm:$0xff] %vm411_vm3, %v408_v4 }
  0xc7   : > { %418 = vst.msk [vmem:[%s657_s27 + $0x30] sm:$0xff] %vm411_vm3, %v385_v5 }
  0xc8   : > { %426 = vst.msk [vmem:[%s657_s27 + $0x70] sm:$0xff] %vm411_vm3, %v393_v6  ;;  %v354_v7 = vpop.f32.mrf.mxu2  ;;  %v374_v9 = vpop.f32.mrf.mxu3 }
  0xc9   : > { %v355_v8 = vadd.f32 %v649_v55, %v354_v7  ;;  %v316_v10 = vpop.f32.mrf.mxu0  ;;  %v375_v11 = vadd.f32 %v649_v55, %v374_v9  ;;  %v336_v13 = vpop.f32.mrf.mxu1 }
  0xca   : > { %v317_v12 = vadd.f32 %v649_v55, %v316_v10  ;;  %v337_v15 = vadd.f32 %v649_v55, %v336_v13 }
  0xcb   : > { %v401_v14 = vmax.f32 %v355_v8, 0.0  ;;  %v409_v16 = vmax.f32 %v375_v11, 0.0 }
  0xcc   : > { %v386_v17 = vmax.f32 %v317_v12, 0.0  ;;  %v394_v18 = vmax.f32 %v337_v15, 0.0 }
  0xcd   : > { %434 = vst.msk [vmem:[%s657_s27 + $0xb0] sm:$0xff] %vm411_vm3, %v401_v14 }
  0xce   : > { %442 = vst.msk [vmem:[%s657_s27 + $0xf0] sm:$0xff] %vm411_vm3, %v409_v16 }
  0xcf   : > { %419 = vst.msk [vmem:[%s657_s27 + $0x38] sm:$0xff] %vm411_vm3, %v386_v17 }
  0xd0   : > { %427 = vst.msk [vmem:[%s657_s27 + $0x78] sm:$0xff] %vm411_vm3, %v394_v18  ;;  %v356_v19 = vpop.f32.mrf.mxu2  ;;  %v376_v21 = vpop.f32.mrf.mxu3 }
  0xd1   : > { %v357_v20 = vadd.f32 %v649_v55, %v356_v19  ;;  %v377_v22 = vadd.f32 %v649_v55, %v376_v21 }
  0xd3   : > { %v402_v23 = vmax.f32 %v357_v20, 0.0  ;;  %v410_v24 = vmax.f32 %v377_v22, 0.0 }
  0xd5   : > { %435 = vst.msk [vmem:[%s657_s27 + $0xb8] sm:$0xff] %vm411_vm3, %v402_v23 }
  0xd6   : > { %443 = vst.msk [vmem:[%s657_s27 + $0xf8] sm:$0xff] %vm411_vm3, %v410_v24 }
  0xd7 PF: > { %s13_s12 = sadd.s32 1, %s551_s12  }
  0xd8   : > { %p10_p4 = scmp.ge.s32.totalorder %s13_s12, 12  }
  0xda   :  { %12 = sbr.rel (!%p10_p4) target bundleno = 1 (0x1), region = 62 }

// kernel: encode_fn.3
= control target key start
LH: loop header
LB: loop body
LE: loop exit
PB: predicated region body
PF: predicated region fallthrough
CT: control target
= control target key end

     0   :  { %s1593_s12 = smov 0   ;;  %s2099_s0 = inlined_call_operand.vmem [shape: f32[768,576], index: 0, kind: input, shape index: {}]   ;;  %s2100_s1 = inlined_call_operand.vmem [shape: bf16[576,64], index: 1, kind: input, shape index: {}]   ;;  %s2101_s2 = inlined_call_operand.vmem [shape: f32[1,64], index: 2, kind: input, shape index: {}]   ;;  %s2102_s3 = inlined_call_operand.vmem [shape: f32[768,64], index: 3, kind: output, shape index: {}]  }
   0x1 LB: > { %s1324_s13 = sadd.s32 4294967295, %s1571_s12   ;;  %p1328_p0 = scmp.ge.s32.totalorder %s1571_s12, 1  ;;  %s1571_s12 = sphi %s1593_s12, %s13_s12  }
   0x2   : > { %p139_p1 = scmp.lt.s32.totalorder %s1571_s12, 4 }
   0x4   : > { %p140_p2 = pnand %p1328_p0, %p139_p1 }
   0x5   : > { %s1329_s20 = sshll.u32 (!%p140_p2), %s1324_s13, 5 }
   0x6   : > { %143 = sbr.rel (%p140_p2) target bundleno = 496 (0x1f0), region = 32  ;;  %p165_p3 = scmp.lt.s32.totalorder (!%p140_p2), %s1329_s20, 95 }
   0xb   : > { %v1502_v0 = vld [vmem:[%s2100_s1 + $0x38] sm:$0xff]  ;;  %v1501_v1 = vld [vmem:[%s2100_s1 + $0x30] sm:$0xff]  ;;  %v1500_v2 = vld [vmem:[%s2100_s1 + $0x28] sm:$0xff]  ;;  %s2104_s20 = smov (!%p165_p3, %s1329_s20), 95  ;;  %vm710_vm0 = vcmask 523264  }
   0xc   : > { %1531 = vmatpush.bf16.msra.mxu1 %v1502_v0  ;;  %1532 = vmatpush.bf16.msra.mxu2 %v1502_v0  ;;  %v1499_v3 = vld [vmem:[%s2100_s1 + $0x20] sm:$0xff]  ;;  %v1498_v4 = vld [vmem:[%s2100_s1 + $0x18] sm:$0xff]  ;;  %v1497_v5 = vld [vmem:[%s2100_s1 + $0x10] sm:$0xff]  ;;  %s1555_s27 = smul.u32 40, %s2104_s20  ;;  %s1332_s19 = sshll.u32 %s2104_s20, 3 }
   0xd   : > { %1533 = vmatpush.bf16.msra.mxu3 %v1502_v0  ;;  %759 = vmatpush.bf16.msra.mxu0 %v1502_v0  ;;  %v1496_v6 = vld [vmem:[%s2100_s1 + $0x8] sm:$0xff]  ;;  %v1495_v7 = vld [vmem:[%s2100_s1] sm:$0xff]  ;;  %v1518_v16 = vld [vmem:[%s2100_s1 + $0xb8] sm:$0xff]  ;;  %s1933_s23 = scalar_lea.vmem %s2102_s3, %s1332_s19 }
   0xe   : > { %s1628_s5 = scalar_lea.vmem %s2099_s0, %s1555_s27  ;;  %v1526_v17 = vld [vmem:[%s2100_s1 + $0xf8] sm:$0xff]  ;;  %v1517_v24 = vld [vmem:[%s2100_s1 + $0xb0] sm:$0xff]  ;;  %v1516_v28 = vld [vmem:[%s2100_s1 + $0xa8] sm:$0xff] }
   0xf   : > { %v218_v8 = vld [vmem:[%s1628_s5 + $0x140] sm:$0xff]  ;;  %v223_v9 = vld [vmem:[%s1628_s5 + $0x168] sm:$0xff]  ;;  %v1510_v22 = vld [vmem:[%s2100_s1 + $0x78] sm:$0xff] }
  0x10   : > { %1534 = vmatpush.bf16.msra.mxu1 %v1501_v1  ;;  %1535 = vmatpush.bf16.msra.mxu2 %v1501_v1  ;;  %v258_v10 = vld [vmem:[%s1628_s5 + $0x280] sm:$0xff]  ;;  %v263_v11 = vld [vmem:[%s1628_s5 + $0x2a8] sm:$0xff]  ;;  %v358_v18 = vpack.c.bf16 %v223_v9, %v218_v8  ;;  %v1530_v23 = vld [vmem:[%s2100_s1 + $0x118] sm:$0xff] }
  0x11   : > { %1536 = vmatpush.bf16.msra.mxu3 %v1501_v1  ;;  %760 = vmatpush.bf16.msra.mxu0 %v1501_v1  ;;  %v298_v12 = vld [vmem:[%s1628_s5 + $0x3c0] sm:$0xff]  ;;  %v303_v13 = vld [vmem:[%s1628_s5 + $0x3e8] sm:$0xff]  ;;  %v378_v19 = vpack.c.bf16 %v263_v11, %v258_v10  ;;  %v1525_v25 = vld [vmem:[%s2100_s1 + $0xf0] sm:$0xff] }
  0x12   : > { %v178_v14 = vld [vmem:[%s1628_s5] sm:$0xff]  ;;  %v183_v15 = vld [vmem:[%s1628_s5 + $0x28] sm:$0xff]  ;;  %v398_v20 = vpack.c.bf16 %v303_v13, %v298_v12  ;;  %v1509_v26 = vld [vmem:[%s2100_s1 + $0x70] sm:$0xff] }
  0x13   : > { %v338_v21 = vpack.c.bf16 %v183_v15, %v178_v14  ;;  %v1529_v27 = vld [vmem:[%s2100_s1 + $0x110] sm:$0xff]  ;;  %v1524_v29 = vld [vmem:[%s2100_s1 + $0xe8] sm:$0xff]  ;;  %v1515_v32 = vld [vmem:[%s2100_s1 + $0xa0] sm:$0xff] }
  0x14   : > { %1537 = vmatpush.bf16.msra.mxu1 %v1500_v2  ;;  %1538 = vmatpush.bf16.msra.mxu2 %v1500_v2  ;;  %v1508_v30 = vld [vmem:[%s2100_s1 + $0x68] sm:$0xff]  ;;  %v1523_v33 = vld [vmem:[%s2100_s1 + $0xe0] sm:$0xff]  ;;  %v228_v34 = vld [vmem:[%s1628_s5 + $0x190] sm:$0xff] }
  0x15   : > { %1539 = vmatpush.bf16.msra.mxu3 %v1500_v2  ;;  %761 = vmatpush.bf16.msra.mxu0 %v1500_v2  ;;  %v1528_v31 = vld [vmem:[%s2100_s1 + $0x108] sm:$0xff]  ;;  %v233_v35 = vld [vmem:[%s1628_s5 + $0x1b8] sm:$0xff]  ;;  %v268_v36 = vld [vmem:[%s1628_s5 + $0x2d0] sm:$0xff] }
  0x16   : > { %v273_v37 = vld [vmem:[%s1628_s5 + $0x2f8] sm:$0xff]  ;;  %v308_v38 = vld [vmem:[%s1628_s5 + $0x410] sm:$0xff]  ;;  %v1507_v42 = vld [vmem:[%s2100_s1 + $0x60] sm:$0xff]  ;;  %v363_v45 = vpack.c.bf16 %v233_v35, %v228_v34 }
  0x17   : > { %v313_v39 = vld [vmem:[%s1628_s5 + $0x438] sm:$0xff]  ;;  %v188_v40 = vld [vmem:[%s1628_s5 + $0x50] sm:$0xff]  ;;  %v383_v46 = vpack.c.bf16 %v273_v37, %v268_v36  ;;  %v1527_v53 = vld [vmem:[%s2100_s1 + $0x100] sm:$0xff] }
  0x18   : > { %1540 = vmatpush.bf16.msra.mxu1 %v1499_v3  ;;  %1541 = vmatpush.bf16.msra.mxu2 %v1499_v3  ;;  %v193_v41 = vld [vmem:[%s1628_s5 + $0x78] sm:$0xff]  ;;  %v403_v47 = vpack.c.bf16 %v313_v39, %v308_v38  ;;  %v1513_v50 = vld [vmem:[%s2100_s1 + $0x90] sm:$0xff]  ;;  %v1512_v54 = vld [vmem:[%s2100_s1 + $0x88] sm:$0xff] }
  0x19   : > { %1542 = vmatpush.bf16.msra.mxu3 %v1499_v3  ;;  %762 = vmatpush.bf16.msra.mxu0 %v1499_v3  ;;  %v1514_v43 = vld [vmem:[%s2100_s1 + $0x98] sm:$0xff]  ;;  %v343_v48 = vpack.c.bf16 %v193_v41, %v188_v40  ;;  %v1521_v51 = vld [vmem:[%s2100_s1 + $0xd0] sm:$0xff]  ;;  %v1520_v55 = vld [vmem:[%s2100_s1 + $0xc8] sm:$0xff] }
  0x1a   : > { %v1522_v44 = vld [vmem:[%s2100_s1 + $0xd8] sm:$0xff]  ;;  %v1505_v52 = vld [vmem:[%s2100_s1 + $0x50] sm:$0xff]  ;;  %v1504_v56 = vld [vmem:[%s2100_s1 + $0x48] sm:$0xff] }
  0x1b   : > { %v1506_v49 = vld [vmem:[%s2100_s1 + $0x58] sm:$0xff]  ;;  %v1511_v57 = vld [vmem:[%s2100_s1 + $0x80] sm:$0xff]  ;;  %v243_v60 = vld [vmem:[%s1628_s5 + $0x208] sm:$0xff] }
  0x1c   : > { %1543 = vmatpush.bf16.msra.mxu1 %v1498_v4  ;;  %1544 = vmatpush.bf16.msra.mxu2 %v1498_v4  ;;  %v1519_v58 = vld [vmem:[%s2100_s1 + $0xc0] sm:$0xff]  ;;  %v283_v62 = vld [vmem:[%s1628_s5 + $0x348] sm:$0xff]  ;;  %v248_v8 = vld [vmem:[%s1628_s5 + $0x230] sm:$0xff] }
  0x1d   : > { %1545 = vmatpush.bf16.msra.mxu3 %v1498_v4  ;;  %763 = vmatpush.bf16.msra.mxu0 %v1498_v4  ;;  %v238_v59 = vld [vmem:[%s1628_s5 + $0x1e0] sm:$0xff]  ;;  %v323_v0 = vld [vmem:[%s1628_s5 + $0x488] sm:$0xff]  ;;  %v253_v9 = vld [vmem:[%s1628_s5 + $0x258] sm:$0xff] }
  0x1e   : > { %v278_v61 = vld [vmem:[%s1628_s5 + $0x320] sm:$0xff]  ;;  %v203_v2 = vld [vmem:[%s1628_s5 + $0xc8] sm:$0xff]  ;;  %v368_v4 = vpack.c.bf16 %v243_v60, %v238_v59  ;;  %v288_v10 = vld [vmem:[%s1628_s5 + $0x370] sm:$0xff] }
  0x1f   : > { %v318_v63 = vld [vmem:[%s1628_s5 + $0x460] sm:$0xff]  ;;  %v293_v11 = vld [vmem:[%s1628_s5 + $0x398] sm:$0xff]  ;;  %v328_v12 = vld [vmem:[%s1628_s5 + $0x4b0] sm:$0xff] }
  0x20   : > { %1546 = vmatpush.bf16.msra.mxu1 %v1497_v5  ;;  %1547 = vmatpush.bf16.msra.mxu2 %v1497_v5  ;;  %v198_v1 = vld [vmem:[%s1628_s5 + $0xa0] sm:$0xff]  ;;  %v333_v13 = vld [vmem:[%s1628_s5 + $0x4d8] sm:$0xff]  ;;  %v208_v14 = vld [vmem:[%s1628_s5 + $0xf0] sm:$0xff] }
  0x21   : > { %1548 = vmatpush.bf16.msra.mxu3 %v1497_v5  ;;  %764 = vmatpush.bf16.msra.mxu0 %v1497_v5  ;;  %v1503_v3 = vld [vmem:[%s2100_s1 + $0x40] sm:$0xff]  ;;  %v388_v5 = vpack.c.bf16 %v283_v62, %v278_v61  ;;  %v213_v15 = vld [vmem:[%s1628_s5 + $0x118] sm:$0xff]  ;;  %v195_v35 = vld [vmem:[%s1628_s5 + $0x88] sm:$0xff] }
  0x22   : > { %v190_v34 = vld [vmem:[%s1628_s5 + $0x60] sm:$0xff]  ;;  %v191_v36 = vld [vmem:[%s1628_s5 + $0x68] sm:$0xff]  ;;  %v196_v37 = vld [vmem:[%s1628_s5 + $0x90] sm:$0xff] }
  0x23   : > { %v192_v38 = vld [vmem:[%s1628_s5 + $0x70] sm:$0xff]  ;;  %v197_v39 = vld [vmem:[%s1628_s5 + $0x98] sm:$0xff]  ;;  %v345_v41 = vpack.c.bf16 %v195_v35, %v190_v34  ;;  %v215_v59 = vld [vmem:[%s1628_s5 + $0x128] sm:$0xff] }
  0x24   : > { %1549 = vmatpush.bf16.msra.mxu1 %v1496_v6  ;;  %1550 = vmatpush.bf16.msra.mxu2 %v1496_v6  ;;  %v211_v60 = vld [vmem:[%s1628_s5 + $0x108] sm:$0xff]  ;;  %v216_v61 = vld [vmem:[%s1628_s5 + $0x130] sm:$0xff]  ;;  %v237_v34 = vld [vmem:[%s1628_s5 + $0x1d8] sm:$0xff] }
  0x25   : > { %1551 = vmatpush.bf16.msra.mxu3 %v1496_v6  ;;  %765 = vmatpush.bf16.msra.mxu0 %v1496_v6  ;;  %v408_v6 = vpack.c.bf16 %v323_v0, %v318_v63  ;;  %v212_v62 = vld [vmem:[%s1628_s5 + $0x110] sm:$0xff]  ;;  %v217_v63 = vld [vmem:[%s1628_s5 + $0x138] sm:$0xff] }
  0x28   : > { %1552 = vmatpush.bf16.msra.mxu1 %v1495_v7  ;;  %1553 = vmatpush.bf16.msra.mxu2 %v1495_v7 }
  0x29   : > { %1554 = vmatpush.bf16.msra.mxu3 %v1495_v7  ;;  %766 = vmatpush.bf16.msra.mxu0 %v1495_v7  ;;  %v348_v7 = vpack.c.bf16 %v203_v2, %v198_v1  ;;  %v356_v2 = vpack.c.bf16 %v216_v61, %v211_v60  ;;  %v247_v60 = vld [vmem:[%s1628_s5 + $0x228] sm:$0xff] }
  0x2b   : > { %787 = vmatmul.bf16.vlgmr.msra.gmra.mxu1 %v358_v18  ;;  %807 = vmatmul.bf16.vlgmr.msra.gmra.mxu2 %v378_v19  ;;  %v413_v18 = vpack.c.bf16 %v333_v13, %v328_v12  ;;  %v353_v19 = vpack.c.bf16 %v213_v15, %v208_v14  ;;  %v227_v12 = vld [vmem:[%s1628_s5 + $0x188] sm:$0xff] }
  0x2c   : > { %937 = vmatpush.bf16.msrb.mxu2 %v1518_v16  ;;  %827 = vmatmul.bf16.vlgmr.msra.gmra.mxu3 %v398_v20  ;;  %v373_v16 = vpack.c.bf16 %v253_v9, %v248_v8  ;;  %v179_v20 = vld [vmem:[%s1628_s5 + $0x8] sm:$0xff]  ;;  %v225_v8 = vld [vmem:[%s1628_s5 + $0x178] sm:$0xff] }
  0x2d   : > { %1026 = vmatpush.bf16.msrb.mxu3 %v1526_v17  ;;  %767 = vmatmul.bf16.vlgmr.msra.gmra.mxu0 %v338_v21  ;;  %v393_v17 = vpack.c.bf16 %v293_v11, %v288_v10  ;;  %v184_v21 = vld [vmem:[%s1628_s5 + $0x30] sm:$0xff]  ;;  %v221_v9 = vld [vmem:[%s1628_s5 + $0x158] sm:$0xff]  ;;  %v226_v10 = vld [vmem:[%s1628_s5 + $0x180] sm:$0xff] }
  0x2e   : > { %848 = vmatpush.bf16.msrb.mxu1 %v1510_v22  ;;  %1119 = vmatpush.bf16.msrb.mxu0 %v1530_v23  ;;  %v180_v22 = vld [vmem:[%s1628_s5 + $0x10] sm:$0xff]  ;;  %v185_v23 = vld [vmem:[%s1628_s5 + $0x38] sm:$0xff]  ;;  %v222_v11 = vld [vmem:[%s1628_s5 + $0x160] sm:$0xff] }
  0x30   : > { %938 = vmatpush.bf16.msrb.mxu2 %v1517_v24  ;;  %v181_v24 = vld [vmem:[%s1628_s5 + $0x18] sm:$0xff] }
  0x31   : > { %1027 = vmatpush.bf16.msrb.mxu3 %v1525_v25  ;;  %v186_v25 = vld [vmem:[%s1628_s5 + $0x40] sm:$0xff] }
  0x32   : > { %849 = vmatpush.bf16.msrb.mxu1 %v1509_v26  ;;  %1120 = vmatpush.bf16.msrb.mxu0 %v1529_v27  ;;  %v182_v26 = vld [vmem:[%s1628_s5 + $0x20] sm:$0xff]  ;;  %v187_v27 = vld [vmem:[%s1628_s5 + $0x48] sm:$0xff] }
  0x34   : > { %939 = vmatpush.bf16.msrb.mxu2 %v1516_v28  ;;  %v339_v28 = vpack.c.bf16 %v184_v21, %v179_v20 }
  0x35   : > { %1028 = vmatpush.bf16.msrb.mxu3 %v1524_v29  ;;  %v340_v29 = vpack.c.bf16 %v185_v23, %v180_v22 }
  0x36   : > { %850 = vmatpush.bf16.msrb.mxu1 %v1508_v30  ;;  %1121 = vmatpush.bf16.msrb.mxu0 %v1528_v31  ;;  %v341_v30 = vpack.c.bf16 %v186_v25, %v181_v24  ;;  %v342_v31 = vpack.c.bf16 %v187_v27, %v182_v26  ;;  %v229_v27 = vld [vmem:[%s1628_s5 + $0x198] sm:$0xff] }
  0x38   : > { %940 = vmatpush.bf16.msrb.mxu2 %v1515_v32  ;;  %v189_v32 = vld [vmem:[%s1628_s5 + $0x58] sm:$0xff] }
  0x39   : > { %1029 = vmatpush.bf16.msrb.mxu3 %v1523_v33  ;;  %v194_v33 = vld [vmem:[%s1628_s5 + $0x80] sm:$0xff] }
  0x3a   : > { %851 = vmatpush.bf16.msrb.mxu1 %v1507_v42  ;;  %1122 = vmatpush.bf16.msrb.mxu0 %v1527_v53  ;;  %v344_v40 = vpack.c.bf16 %v194_v33, %v189_v32  ;;  %v346_v42 = vpack.c.bf16 %v196_v37, %v191_v36  ;;  %v236_v32 = vld [vmem:[%s1628_s5 + $0x1d0] sm:$0xff] }
  0x3b   : > { %792 = vmatmul.bf16.gmra.mxu1 %v363_v45  ;;  %812 = vmatmul.bf16.gmra.mxu2 %v383_v46  ;;  %v204_v45 = vld [vmem:[%s1628_s5 + $0xd0] sm:$0xff] }
  0x3c   : > { %941 = vmatpush.bf16.msrb.mxu2 %v1514_v43  ;;  %832 = vmatmul.bf16.gmra.mxu3 %v403_v47  ;;  %v347_v43 = vpack.c.bf16 %v197_v39, %v192_v38  ;;  %v200_v46 = vld [vmem:[%s1628_s5 + $0xb0] sm:$0xff]  ;;  %v205_v47 = vld [vmem:[%s1628_s5 + $0xd8] sm:$0xff] }
  0x3d   : > { %1030 = vmatpush.bf16.msrb.mxu3 %v1522_v44  ;;  %772 = vmatmul.bf16.gmra.mxu0 %v343_v48  ;;  %v199_v44 = vld [vmem:[%s1628_s5 + $0xa8] sm:$0xff]  ;;  %v201_v48 = vld [vmem:[%s1628_s5 + $0xb8] sm:$0xff]  ;;  %v350_v53 = vpack.c.bf16 %v205_v47, %v200_v46  ;;  %v232_v33 = vld [vmem:[%s1628_s5 + $0x1b0] sm:$0xff] }
  0x3e   : > { %852 = vmatpush.bf16.msrb.mxu1 %v1506_v49  ;;  %v206_v49 = vld [vmem:[%s1628_s5 + $0xe0] sm:$0xff] }
  0x40   : > { %942 = vmatpush.bf16.msrb.mxu2 %v1513_v50  ;;  %v202_v50 = vld [vmem:[%s1628_s5 + $0xc0] sm:$0xff] }
  0x41   : > { %1031 = vmatpush.bf16.msrb.mxu3 %v1521_v51  ;;  %v207_v51 = vld [vmem:[%s1628_s5 + $0xe8] sm:$0xff] }
  0x42   : > { %853 = vmatpush.bf16.msrb.mxu1 %v1505_v52  ;;  %v349_v52 = vpack.c.bf16 %v204_v45, %v199_v44 }
  0x44   : > { %943 = vmatpush.bf16.msrb.mxu2 %v1512_v54  ;;  %v351_v54 = vpack.c.bf16 %v206_v49, %v201_v48 }
  0x45   : > { %1032 = vmatpush.bf16.msrb.mxu3 %v1520_v55  ;;  %v352_v55 = vpack.c.bf16 %v207_v51, %v202_v50 }
  0x46   : > { %854 = vmatpush.bf16.msrb.mxu1 %v1504_v56  ;;  %v209_v56 = vld [vmem:[%s1628_s5 + $0xf8] sm:$0xff] }
  0x48   : > { %944 = vmatpush.bf16.msrb.mxu2 %v1511_v57  ;;  %v214_v57 = vld [vmem:[%s1628_s5 + $0x120] sm:$0xff] }
  0x49   : > { %1033 = vmatpush.bf16.msrb.mxu3 %v1519_v58  ;;  %v210_v58 = vld [vmem:[%s1628_s5 + $0x100] sm:$0xff]  ;;  %v354_v0 = vpack.c.bf16 %v214_v57, %v209_v56  ;;  %v245_v56 = vld [vmem:[%s1628_s5 + $0x218] sm:$0xff] }
  0x4a   : > { %855 = vmatpush.bf16.msrb.mxu1 %v1503_v3  ;;  %v355_v1 = vpack.c.bf16 %v215_v59, %v210_v58  ;;  %v357_v3 = vpack.c.bf16 %v217_v63, %v212_v62  ;;  %v241_v57 = vld [vmem:[%s1628_s5 + $0x1f8] sm:$0xff]  ;;  %v246_v58 = vld [vmem:[%s1628_s5 + $0x220] sm:$0xff] }
  0x4b   : > { %797 = vmatmul.bf16.gmra.mxu1 %v368_v4  ;;  %817 = vmatmul.bf16.gmra.mxu2 %v388_v5  ;;  %v1788_v4 = vld [vmem:[%s2101_s2] ss:$0 sm:$0xff]  ;;  %v219_v5 = vld [vmem:[%s1628_s5 + $0x148] sm:$0xff] }
  0x4c   : > { %837 = vmatmul.bf16.gmra.mxu3 %v408_v6  ;;  %v224_v6 = vld [vmem:[%s1628_s5 + $0x170] sm:$0xff]  ;;  %v242_v59 = vld [vmem:[%s1628_s5 + $0x200] sm:$0xff] }
  0x4d   : > { %777 = vmatmul.bf16.gmra.mxu0 %v348_v7  ;;  %v220_v7 = vld [vmem:[%s1628_s5 + $0x150] sm:$0xff]  ;;  %v359_v13 = vpack.c.bf16 %v224_v6, %v219_v5  ;;  %v371_v5 = vpack.c.bf16 %v246_v58, %v241_v57  ;;  %v372_v6 = vpack.c.bf16 %v247_v60, %v242_v59  ;;  %v265_v59 = vld [vmem:[%s1628_s5 + $0x2b8] sm:$0xff] }
  0x4e   : > { %v360_v14 = vpack.c.bf16 %v225_v8, %v220_v7  ;;  %v264_v57 = vld [vmem:[%s1628_s5 + $0x2b0] sm:$0xff]  ;;  %v261_v60 = vld [vmem:[%s1628_s5 + $0x298] sm:$0xff] }
  0x4f   : > { %v260_v58 = vld [vmem:[%s1628_s5 + $0x290] sm:$0xff] }
  0x5b   : > { %802 = vmatmul.bf16.gmra.mxu1 %v373_v16  ;;  %822 = vmatmul.bf16.gmra.mxu2 %v393_v17  ;;  %v361_v16 = vpack.c.bf16 %v226_v10, %v221_v9  ;;  %v362_v17 = vpack.c.bf16 %v227_v12, %v222_v11 }
  0x5c   : > { %842 = vmatmul.bf16.gmra.mxu3 %v413_v18 }
  0x5d   : > { %782 = vmatmul.bf16.gmra.mxu0 %v353_v19 }
  0x6b   : > { %856 = vmatmul.bf16.vlgmr.msrb.gmra.mxu1 %v339_v28  ;;  %945 = vmatmul.bf16.vlgmr.msrb.gmra.mxu2 %v340_v29  ;;  %v234_v28 = vld [vmem:[%s1628_s5 + $0x1c0] sm:$0xff] }
  0x6c   : > { %1034 = vmatmul.bf16.vlgmr.msrb.gmra.mxu3 %v341_v30  ;;  %v230_v29 = vld [vmem:[%s1628_s5 + $0x1a0] sm:$0xff]  ;;  %v235_v30 = vld [vmem:[%s1628_s5 + $0x1c8] sm:$0xff]  ;;  %v364_v38 = vpack.c.bf16 %v234_v28, %v229_v27  ;;  %v256_v27 = vld [vmem:[%s1628_s5 + $0x270] sm:$0xff] }
  0x6d   : > { %1477 = vmatmul.msk.bf16.vlgmr.msrb.gmra.mxu0 %vm710_vm0, %v342_v31  ;;  %v231_v31 = vld [vmem:[%s1628_s5 + $0x1a8] sm:$0xff]  ;;  %v365_v39 = vpack.c.bf16 %v235_v30, %v230_v29  ;;  %v252_v28 = vld [vmem:[%s1628_s5 + $0x250] sm:$0xff]  ;;  %v257_v29 = vld [vmem:[%s1628_s5 + $0x278] sm:$0xff] }
  0x7b   : > { %861 = vmatmul.bf16.gmra.mxu1 %v344_v40  ;;  %950 = vmatmul.bf16.gmra.mxu2 %v345_v41 }
  0x7c   : > { %1039 = vmatmul.bf16.gmra.mxu3 %v346_v42  ;;  %v366_v42 = vpack.c.bf16 %v236_v32, %v231_v31 }
  0x7d   : > { %1478 = vmatmul.msk.bf16.gmra.mxu0 %vm710_vm0, %v347_v43  ;;  %v367_v43 = vpack.c.bf16 %v237_v34, %v232_v33 }
  0x8b   : > { %866 = vmatmul.bf16.gmra.mxu1 %v349_v52  ;;  %955 = vmatmul.bf16.gmra.mxu2 %v350_v53  ;;  %v239_v53 = vld [vmem:[%s1628_s5 + $0x1e8] sm:$0xff] }
  0x8c   : > { %1044 = vmatmul.bf16.gmra.mxu3 %v351_v54  ;;  %v244_v54 = vld [vmem:[%s1628_s5 + $0x210] sm:$0xff] }
  0x8d   : > { %1479 = vmatmul.msk.bf16.gmra.mxu0 %vm710_vm0, %v352_v55  ;;  %v240_v55 = vld [vmem:[%s1628_s5 + $0x1f0] sm:$0xff] }
  0x9b   : > { %871 = vmatmul.bf16.gmra.mxu1 %v354_v0  ;;  %960 = vmatmul.bf16.gmra.mxu2 %v355_v1  ;;  %v369_v0 = vpack.c.bf16 %v244_v54, %v239_v53  ;;  %v370_v1 = vpack.c.bf16 %v245_v56, %v240_v55  ;;  %v259_v56 = vld [vmem:[%s1628_s5 + $0x288] sm:$0xff] }
  0x9c   : > { %1049 = vmatmul.bf16.gmra.mxu3 %v356_v2 }
  0x9d   : > { %1480 = vmatmul.msk.bf16.gmra.mxu0 %vm710_vm0, %v357_v3 }
  0xa8   : > { %v788_v15 = vpop.f32.mrf.mxu1 }
  0xa9   : > { %v1799_v18 = vadd.f32 %v1788_v4, %v788_v15 }
  0xaa   : > { %v1801_v19 = vpop.f32.mrf.mxu0 }
  0xab   : > { %876 = vmatmul.bf16.gmra.mxu1 %v359_v13  ;;  %965 = vmatmul.bf16.gmra.mxu2 %v360_v14 }
  0xac   : > { %1054 = vmatmul.bf16.gmra.mxu3 %v361_v16  ;;  %v249_v16 = vld [vmem:[%s1628_s5 + $0x238] sm:$0xff] }
  0xad   : > { %1481 = vmatmul.msk.bf16.gmra.mxu0 %vm710_vm0, %v362_v17  ;;  %v254_v17 = vld [vmem:[%s1628_s5 + $0x260] sm:$0xff] }
  0xae   : > { %v808_v20 = vpop.f32.mrf.mxu2  ;;  %v374_v33 = vpack.c.bf16 %v254_v17, %v249_v16 }
  0xaf   : > { %v1805_v21 = vadd.f32 %v1788_v4, %v808_v20  ;;  %v828_v22 = vpop.f32.mrf.mxu3  ;;  %v250_v20 = vld [vmem:[%s1628_s5 + $0x240] sm:$0xff] }
  0xb0   : > { %v1808_v23 = vadd.f32 %v1788_v4, %v828_v22  ;;  %v790_v24 = vpop.f32.mrf.mxu1  ;;  %v255_v22 = vld [vmem:[%s1628_s5 + $0x268] sm:$0xff] }
  0xb1   : > { %v1811_v25 = vadd.f32 %v1788_v4, %v790_v24  ;;  %v251_v24 = vld [vmem:[%s1628_s5 + $0x248] sm:$0xff]  ;;  %v375_v34 = vpack.c.bf16 %v255_v22, %v250_v20  ;;  %v769_v22 = vadd.f32 %v1788_v4, %v1801_v19 }
  0xb2   : > { %v1813_v26 = vpop.f32.mrf.mxu0 }
  0xb6   : > { %v810_v35 = vpop.f32.mrf.mxu2 }
  0xb7   : > { %v1824_v36 = vadd.f32 %v1788_v4, %v810_v35  ;;  %v830_v37 = vpop.f32.mrf.mxu3 }
  0xb8   : > { %v1827_v40 = vadd.f32 %v1788_v4, %v830_v37  ;;  %v793_v41 = vpop.f32.mrf.mxu1 }
  0xb9   : > { %v1830_v44 = vadd.f32 %v1788_v4, %v793_v41 }
  0xba   : > { %v1832_v45 = vpop.f32.mrf.mxu0 }
  0xbb   : > { %881 = vmatmul.bf16.gmra.mxu1 %v364_v38  ;;  %970 = vmatmul.bf16.gmra.mxu2 %v365_v39  ;;  %v376_v38 = vpack.c.bf16 %v256_v27, %v251_v24  ;;  %v377_v39 = vpack.c.bf16 %v257_v29, %v252_v28 }
  0xbc   : > { %1059 = vmatmul.bf16.gmra.mxu3 %v366_v42 }
  0xbd   : > { %1482 = vmatmul.msk.bf16.gmra.mxu0 %vm710_vm0, %v367_v43 }
  0xbe   : > { %v813_v46 = vpop.f32.mrf.mxu2 }
  0xbf   : > { %v1836_v47 = vadd.f32 %v1788_v4, %v813_v46  ;;  %v833_v48 = vpop.f32.mrf.mxu3 }
  0xc0   : > { %v1839_v49 = vadd.f32 %v1788_v4, %v833_v48  ;;  %v795_v50 = vpop.f32.mrf.mxu1 }
  0xc1   : > { %v1842_v51 = vadd.f32 %v1788_v4, %v795_v50 }
  0xc2   : > { %v1844_v52 = vpop.f32.mrf.mxu0 }
  0xc6   : > { %v815_v61 = vpop.f32.mrf.mxu2 }
  0xc7   : > { %v1855_v62 = vadd.f32 %v1788_v4, %v815_v61  ;;  %v835_v63 = vpop.f32.mrf.mxu3  ;;  %v266_v61 = vld [vmem:[%s1628_s5 + $0x2c0] sm:$0xff] }
  0xc8   : > { %v1858_v2 = vadd.f32 %v1788_v4, %v835_v63  ;;  %v798_v3 = vpop.f32.mrf.mxu1  ;;  %v262_v63 = vld [vmem:[%s1628_s5 + $0x2a0] sm:$0xff]  ;;  %v381_v16 = vpack.c.bf16 %v266_v61, %v261_v60 }
  0xc9   : > { %v1861_v7 = vadd.f32 %v1788_v4, %v798_v3 }
  0xca   : > { %v1863_v8 = vpop.f32.mrf.mxu0 }
  0xcb   : > { %886 = vmatmul.bf16.gmra.mxu1 %v369_v0  ;;  %975 = vmatmul.bf16.gmra.mxu2 %v370_v1  ;;  %v267_v0 = vld [vmem:[%s1628_s5 + $0x2c8] sm:$0xff] }
  0xcc   : > { %1064 = vmatmul.bf16.gmra.mxu3 %v371_v5  ;;  %v382_v17 = vpack.c.bf16 %v267_v0, %v262_v63 }
  0xcd   : > { %1483 = vmatmul.msk.bf16.gmra.mxu0 %vm710_vm0, %v372_v6  ;;  %v379_v6 = vpack.c.bf16 %v264_v57, %v259_v56  ;;  %v276_v57 = vld [vmem:[%s1628_s5 + $0x310] sm:$0xff] }
  0xce   : > { %v818_v9 = vpop.f32.mrf.mxu2 }
  0xcf   : > { %v1867_v10 = vadd.f32 %v1788_v4, %v818_v9  ;;  %v838_v11 = vpop.f32.mrf.mxu3  ;;  %v380_v9 = vpack.c.bf16 %v265_v59, %v260_v58  ;;  %v272_v58 = vld [vmem:[%s1628_s5 + $0x2f0] sm:$0xff]  ;;  %v277_v59 = vld [vmem:[%s1628_s5 + $0x318] sm:$0xff] }
  0xd0   : > { %v1870_v12 = vadd.f32 %v1788_v4, %v838_v11  ;;  %v800_v13 = vpop.f32.mrf.mxu1 }
  0xd1   : > { %v1873_v14 = vadd.f32 %v1788_v4, %v800_v13 }
  0xd2   : > { %v1875_v15 = vpop.f32.mrf.mxu0 }
  0xd6   : > { %v820_v30 = vpop.f32.mrf.mxu2 }
  0xd7   : > { %v1886_v31 = vadd.f32 %v1788_v4, %v820_v30  ;;  %v840_v32 = vpop.f32.mrf.mxu3 }
  0xd8   : > { %v1889_v35 = vadd.f32 %v1788_v4, %v840_v32  ;;  %v803_v37 = vpop.f32.mrf.mxu1 }
  0xd9   : > { %v1892_v41 = vadd.f32 %v1788_v4, %v803_v37  ;;  %v269_v37 = vld [vmem:[%s1628_s5 + $0x2d8] sm:$0xff] }
  0xda   : > { %v1894_v42 = vpop.f32.mrf.mxu0 }
  0xdb   : > { %891 = vmatmul.bf16.gmra.mxu1 %v374_v33  ;;  %980 = vmatmul.bf16.gmra.mxu2 %v375_v34  ;;  %v771_v33 = vadd.f32 %v1788_v4, %v1813_v26 }
  0xdc   : > { %1069 = vmatmul.bf16.gmra.mxu3 %v376_v38  ;;  %v274_v38 = vld [vmem:[%s1628_s5 + $0x300] sm:$0xff] }
  0xdd   : > { %1484 = vmatmul.msk.bf16.gmra.mxu0 %vm710_vm0, %v377_v39  ;;  %v270_v39 = vld [vmem:[%s1628_s5 + $0x2e0] sm:$0xff]  ;;  %v384_v63 = vpack.c.bf16 %v274_v38, %v269_v37  ;;  %v280_v37 = vld [vmem:[%s1628_s5 + $0x330] sm:$0xff]  ;;  %v285_v38 = vld [vmem:[%s1628_s5 + $0x358] sm:$0xff] }
  0xde   : > { %v823_v43 = vpop.f32.mrf.mxu2 }
  0xdf   : > { %v1898_v46 = vadd.f32 %v1788_v4, %v823_v43  ;;  %v843_v48 = vpop.f32.mrf.mxu3  ;;  %v275_v43 = vld [vmem:[%s1628_s5 + $0x308] sm:$0xff] }
  0xe0   : > { %v1901_v50 = vadd.f32 %v1788_v4, %v843_v48  ;;  %v805_v53 = vpop.f32.mrf.mxu1  ;;  %v271_v48 = vld [vmem:[%s1628_s5 + $0x2e8] sm:$0xff]  ;;  %v385_v0 = vpack.c.bf16 %v275_v43, %v270_v39  ;;  %v281_v39 = vld [vmem:[%s1628_s5 + $0x338] sm:$0xff] }
  0xe1   : > { %v1904_v54 = vadd.f32 %v1788_v4, %v805_v53 }
  0xe2   : > { %v1906_v55 = vpop.f32.mrf.mxu0 }
  0xe6   : > { %v825_v1 = vpop.f32.mrf.mxu2 }
  0xe7   : > { %v1917_v3 = vadd.f32 %v1788_v4, %v825_v1  ;;  %v845_v5 = vpop.f32.mrf.mxu3 }
  0xe8   : > { %v1920_v11 = vadd.f32 %v1788_v4, %v845_v5  ;;  %v857_v13 = vpop.f32.mrf.mxu1  ;;  %v386_v5 = vpack.c.bf16 %v276_v57, %v271_v48  ;;  %v287_v57 = vld [vmem:[%s1628_s5 + $0x368] sm:$0xff] }
  0xe9   : > { %v858_v24 = vadd.f32 %v857_v13, %v769_v22 }
  0xea   : > { %v1124_v20 = vpop.f32.mrf.mxu0 }
  0xeb   : > { %896 = vmatmul.bf16.gmra.mxu1 %v379_v6  ;;  %985 = vmatmul.bf16.gmra.mxu2 %v380_v9  ;;  %v387_v6 = vpack.c.bf16 %v277_v59, %v272_v58 }
  0xec   : > { %1074 = vmatmul.bf16.gmra.mxu3 %v381_v16  ;;  %v774_v16 = vadd.f32 %v1788_v4, %v1832_v45 }
  0xed   : > { %1485 = vmatmul.msk.bf16.gmra.mxu0 %vm710_vm0, %v382_v17 }
  0xee   : > { %v946_v27 = vpop.f32.mrf.mxu2 }
  0xef   : > { %v947_v28 = vadd.f32 %v946_v27, %v858_v24  ;;  %v1035_v29 = vpop.f32.mrf.mxu3 }
  0xf0   : > { %v859_v30 = vpop.f32.mrf.mxu1 }
  0xf1   : > { %v1036_v32 = vadd.f32 %v1035_v29, %v947_v28  ;;  %v860_v56 = vadd.f32 %v859_v30, %v771_v33  ;;  %v279_v33 = vld [vmem:[%s1628_s5 + $0x328] sm:$0xff] }
  0xf2   : > { %v1126_v19 = vpop.f32.mrf.mxu0 }
  0xf3   : > { %v1125_v34 = vadd.f32 %v1124_v20, %v1036_v32  ;;  %v776_v32 = vadd.f32 %v1788_v4, %v1844_v52 }
  0xf5   : > { %v1204_v53 = vmax.f32 %v1125_v34, 0.0  ;;  %v284_v34 = vld [vmem:[%s1628_s5 + $0x350] sm:$0xff] }
  0xf6   : > { %v948_v60 = vpop.f32.mrf.mxu2 }
  0xf7   : > { %1236 = vst.msk [vmem:[%s1933_s23] sm:$0xff] %vm710_vm0, %v1204_v53  ;;  %v949_v26 = vadd.f32 %v948_v60, %v860_v56  ;;  %v1037_v61 = vpop.f32.mrf.mxu3  ;;  %v286_v53 = vld [vmem:[%s1628_s5 + $0x360] sm:$0xff] }
  0xf8   : > { %v862_v1 = vpop.f32.mrf.mxu1  ;;  %v282_v56 = vld [vmem:[%s1628_s5 + $0x340] sm:$0xff] }
  0xf9   : > { %v1038_v9 = vadd.f32 %v1037_v61, %v949_v26  ;;  %v863_v22 = vadd.f32 %v862_v1, %v774_v16  ;;  %v389_v26 = vpack.c.bf16 %v284_v34, %v279_v33  ;;  %v390_v61 = vpack.c.bf16 %v285_v38, %v280_v37  ;;  %v291_v33 = vld [vmem:[%s1628_s5 + $0x388] sm:$0xff]  ;;  %v296_v38 = vld [vmem:[%s1628_s5 + $0x3b0] sm:$0xff] }
  0xfa   : > { %v1129_v13 = vpop.f32.mrf.mxu0 }
  0xfb   : > { %v1127_v17 = vadd.f32 %v1126_v19, %v1038_v9  ;;  %901 = vmatmul.bf16.gmra.mxu1 %v384_v63  ;;  %990 = vmatmul.bf16.gmra.mxu2 %v385_v0  ;;  %v391_v63 = vpack.c.bf16 %v286_v53, %v281_v39  ;;  %v392_v0 = vpack.c.bf16 %v287_v57, %v282_v56  ;;  %v292_v39 = vld [vmem:[%s1628_s5 + $0x390] sm:$0xff] }
  0xfc   : > { %1079 = vmatmul.bf16.gmra.mxu3 %v386_v5 }
  0xfd   : > { %1486 = vmatmul.msk.bf16.gmra.mxu0 %vm710_vm0, %v387_v6  ;;  %v1205_v20 = vmax.f32 %v1127_v17, 0.0  ;;  %v779_v6 = vadd.f32 %v1788_v4, %v1863_v8 }
  0xfe   : > { %v951_v24 = vpop.f32.mrf.mxu2 }
  0xff   : > { %1237 = vst.msk [vmem:[%s1933_s23 + $0x8] sm:$0xff] %vm710_vm0, %v1205_v20  ;;  %v952_v27 = vadd.f32 %v951_v24, %v863_v22  ;;  %v1040_v45 = vpop.f32.mrf.mxu3 }
 0x100   : > { %v864_v28 = vpop.f32.mrf.mxu1 }
 0x101   : > { %v1041_v29 = vadd.f32 %v1040_v45, %v952_v27  ;;  %v865_v48 = vadd.f32 %v864_v28, %v776_v32  ;;  %v781_v45 = vadd.f32 %v1788_v4, %v1875_v15  ;;  %v290_v32 = vld [vmem:[%s1628_s5 + $0x380] sm:$0xff] }
 0x102   : > { %v1131_v30 = vpop.f32.mrf.mxu0 }
 0x103   : > { %v1130_v19 = vadd.f32 %v1129_v13, %v1041_v29  ;;  %v289_v29 = vld [vmem:[%s1628_s5 + $0x378] sm:$0xff] }
 0x105   : > { %v1206_v43 = vmax.f32 %v1130_v19, 0.0  ;;  %v295_v19 = vld [vmem:[%s1628_s5 + $0x3a8] sm:$0xff] }
 0x106   : > { %v953_v58 = vpop.f32.mrf.mxu2 }
 0x107   : > { %1238 = vst.msk [vmem:[%s1933_s23 + $0x10] sm:$0xff] %vm710_vm0, %v1206_v43  ;;  %v954_v59 = vadd.f32 %v953_v58, %v865_v48  ;;  %v1042_v60 = vpop.f32.mrf.mxu3  ;;  %v297_v43 = vld [vmem:[%s1628_s5 + $0x3b8] sm:$0xff]  ;;  %v395_v58 = vpack.c.bf16 %v295_v19, %v290_v32  ;;  %v302_v32 = vld [vmem:[%s1628_s5 + $0x3e0] sm:$0xff]  ;;  %v307_v19 = vld [vmem:[%s1628_s5 + $0x408] sm:$0xff] }
 0x108   : > { %v867_v52 = vpop.f32.mrf.mxu1 }
 0x109   : > { %v1043_v1 = vadd.f32 %v1042_v60, %v954_v59  ;;  %v868_v16 = vadd.f32 %v867_v52, %v779_v6  ;;  %v396_v59 = vpack.c.bf16 %v296_v38, %v291_v33  ;;  %v397_v60 = vpack.c.bf16 %v297_v43, %v292_v39 }
 0x10a   : > { %v1134_v5 = vpop.f32.mrf.mxu0  ;;  %v784_v52 = vadd.f32 %v1788_v4, %v1894_v42  ;;  %v402_v43 = vpack.c.bf16 %v307_v19, %v302_v32 }
 0x10b   : > { %v1132_v9 = vadd.f32 %v1131_v30, %v1043_v1  ;;  %906 = vmatmul.bf16.gmra.mxu1 %v389_v26  ;;  %995 = vmatmul.bf16.gmra.mxu2 %v390_v61  ;;  %v294_v30 = vld [vmem:[%s1628_s5 + $0x3a0] sm:$0xff] }
 0x10c   : > { %1084 = vmatmul.bf16.gmra.mxu3 %v391_v63  ;;  %v394_v57 = vpack.c.bf16 %v294_v30, %v289_v29  ;;  %v306_v30 = vld [vmem:[%s1628_s5 + $0x400] sm:$0xff] }
 0x10d   : > { %1487 = vmatmul.msk.bf16.gmra.mxu0 %vm710_vm0, %v392_v0  ;;  %v1207_v13 = vmax.f32 %v1132_v9, 0.0 }
 0x10e   : > { %v956_v17 = vpop.f32.mrf.mxu2 }
 0x10f   : > { %1239 = vst.msk [vmem:[%s1933_s23 + $0x18] sm:$0xff] %vm710_vm0, %v1207_v13  ;;  %v957_v20 = vadd.f32 %v956_v17, %v868_v16  ;;  %v1045_v8 = vpop.f32.mrf.mxu3  ;;  %v786_v17 = vadd.f32 %v1788_v4, %v1906_v55 }
 0x110   : > { %v869_v22 = vpop.f32.mrf.mxu1 }
 0x111   : > { %v1046_v24 = vadd.f32 %v1045_v8, %v957_v20  ;;  %v870_v37 = vadd.f32 %v869_v22, %v781_v45  ;;  %v299_v8 = vld [vmem:[%s1628_s5 + $0x3c8] sm:$0xff]  ;;  %v304_v22 = vld [vmem:[%s1628_s5 + $0x3f0] sm:$0xff]  ;;  %v301_v45 = vld [vmem:[%s1628_s5 + $0x3d8] sm:$0xff] }
 0x112   : > { %v1136_v27 = vpop.f32.mrf.mxu0  ;;  %v399_v38 = vpack.c.bf16 %v304_v22, %v299_v8  ;;  %v401_v55 = vpack.c.bf16 %v306_v30, %v301_v45 }
 0x113   : > { %v1135_v28 = vadd.f32 %v1134_v5, %v1046_v24  ;;  %v300_v24 = vld [vmem:[%s1628_s5 + $0x3d0] sm:$0xff] }
 0x115   : > { %v1208_v34 = vmax.f32 %v1135_v28, 0.0 }
 0x116   : > { %v958_v48 = vpop.f32.mrf.mxu2 }
 0x117   : > { %1240 = vst.msk [vmem:[%s1933_s23 + $0x20] sm:$0xff] %vm710_vm0, %v1208_v34  ;;  %v959_v53 = vadd.f32 %v958_v48, %v870_v37  ;;  %v1047_v56 = vpop.f32.mrf.mxu3 }
 0x118   : > { %v872_v15 = vpop.f32.mrf.mxu1 }
 0x119   : > { %v1048_v26 = vadd.f32 %v1047_v56, %v959_v53  ;;  %v873_v1 = vadd.f32 %v872_v15, %v784_v52 }
 0x11a   : > { %v1139_v61 = vpop.f32.mrf.mxu0 }
 0x11b   : > { %v1137_v63 = vadd.f32 %v1136_v27, %v1048_v26  ;;  %911 = vmatmul.bf16.gmra.mxu1 %v394_v57  ;;  %1000 = vmatmul.bf16.gmra.mxu2 %v395_v58  ;;  %v305_v27 = vld [vmem:[%s1628_s5 + $0x3f8] sm:$0xff] }
 0x11c   : > { %1089 = vmatmul.bf16.gmra.mxu3 %v396_v59  ;;  %v400_v39 = vpack.c.bf16 %v305_v27, %v300_v24 }
 0x11d   : > { %1488 = vmatmul.msk.bf16.gmra.mxu0 %vm710_vm0, %v397_v60  ;;  %v1209_v0 = vmax.f32 %v1137_v63, 0.0 }
 0x11e   : > { %v961_v5 = vpop.f32.mrf.mxu2 }
 0x11f   : > { %1241 = vst.msk [vmem:[%s1933_s23 + $0x28] sm:$0xff] %vm710_vm0, %v1209_v0  ;;  %v962_v6 = vadd.f32 %v961_v5, %v873_v1  ;;  %v1050_v42 = vpop.f32.mrf.mxu3  ;;  %v309_v0 = vld [vmem:[%s1628_s5 + $0x418] sm:$0xff]  ;;  %v314_v1 = vld [vmem:[%s1628_s5 + $0x440] sm:$0xff] }
 0x120   : > { %v874_v9 = vpop.f32.mrf.mxu1  ;;  %v310_v5 = vld [vmem:[%s1628_s5 + $0x420] sm:$0xff]  ;;  %v404_v24 = vpack.c.bf16 %v314_v1, %v309_v0 }
 0x121   : > { %v1051_v13 = vadd.f32 %v1050_v42, %v962_v6  ;;  %v875_v29 = vadd.f32 %v874_v9, %v786_v17  ;;  %v315_v6 = vld [vmem:[%s1628_s5 + $0x448] sm:$0xff]  ;;  %v317_v17 = vld [vmem:[%s1628_s5 + $0x458] sm:$0xff] }
 0x122   : > { %v1141_v16 = vpop.f32.mrf.mxu0  ;;  %v311_v42 = vld [vmem:[%s1628_s5 + $0x428] sm:$0xff]  ;;  %v405_v27 = vpack.c.bf16 %v315_v6, %v310_v5 }
 0x123   : > { %v1140_v20 = vadd.f32 %v1139_v61, %v1051_v13  ;;  %v316_v13 = vld [vmem:[%s1628_s5 + $0x450] sm:$0xff] }
 0x125   : > { %v1210_v28 = vmax.f32 %v1140_v20, 0.0 }
 0x126   : > { %v963_v33 = vpop.f32.mrf.mxu2 }
 0x127   : > { %1242 = vst.msk [vmem:[%s1933_s23 + $0x30] sm:$0xff] %vm710_vm0, %v1210_v28  ;;  %v964_v34 = vadd.f32 %v963_v33, %v875_v29  ;;  %v1052_v37 = vpop.f32.mrf.mxu3  ;;  %v406_v28 = vpack.c.bf16 %v316_v13, %v311_v42 }
 0x128   : > { %v877_v4 = vpop.f32.mrf.mxu1 }
 0x129   : > { %v1053_v48 = vadd.f32 %v1052_v37, %v964_v34  ;;  %v878_v58 = vadd.f32 %v877_v4, %v1799_v18 }
 0x12a   : > { %v1144_v53 = vpop.f32.mrf.mxu0 }
 0x12b   : > { %v1142_v56 = vadd.f32 %v1141_v16, %v1053_v48  ;;  %916 = vmatmul.bf16.gmra.mxu1 %v399_v38  ;;  %1005 = vmatmul.bf16.gmra.mxu2 %v400_v39  ;;  %v312_v16 = vld [vmem:[%s1628_s5 + $0x430] sm:$0xff]  ;;  %v319_v48 = vld [vmem:[%s1628_s5 + $0x468] sm:$0xff] }
 0x12c   : > { %1094 = vmatmul.bf16.gmra.mxu3 %v401_v55  ;;  %v407_v29 = vpack.c.bf16 %v317_v17, %v312_v16 }
 0x12d   : > { %1489 = vmatmul.msk.bf16.gmra.mxu0 %vm710_vm0, %v402_v43  ;;  %v1211_v57 = vmax.f32 %v1142_v56, 0.0  ;;  %v320_v56 = vld [vmem:[%s1628_s5 + $0x470] sm:$0xff] }
 0x12e   : > { %v966_v15 = vpop.f32.mrf.mxu2 }
 0x12f   : > { %1243 = vst.msk [vmem:[%s1933_s23 + $0x38] sm:$0xff] %vm710_vm0, %v1211_v57  ;;  %v967_v59 = vadd.f32 %v966_v15, %v878_v58  ;;  %v1055_v60 = vpop.f32.mrf.mxu3  ;;  %v325_v57 = vld [vmem:[%s1628_s5 + $0x498] sm:$0xff] }
 0x130   : > { %v879_v26 = vpop.f32.mrf.mxu1  ;;  %v321_v58 = vld [vmem:[%s1628_s5 + $0x478] sm:$0xff]  ;;  %v410_v1 = vpack.c.bf16 %v325_v57, %v320_v56 }
 0x131   : > { %v1056_v61 = vadd.f32 %v1055_v60, %v967_v59  ;;  %v880_v18 = vadd.f32 %v879_v26, %v1811_v25  ;;  %v326_v59 = vld [vmem:[%s1628_s5 + $0x4a0] sm:$0xff]  ;;  %v327_v26 = vld [vmem:[%s1628_s5 + $0x4a8] sm:$0xff] }
 0x132   : > { %v1146_v52 = vpop.f32.mrf.mxu0  ;;  %v322_v60 = vld [vmem:[%s1628_s5 + $0x480] sm:$0xff]  ;;  %v411_v6 = vpack.c.bf16 %v326_v59, %v321_v58 }
 0x133   : > { %v1145_v63 = vadd.f32 %v1144_v53, %v1056_v61  ;;  %v324_v53 = vld [vmem:[%s1628_s5 + $0x490] sm:$0xff]  ;;  %v412_v42 = vpack.c.bf16 %v327_v26, %v322_v60 }
 0x134   : > { %v409_v0 = vpack.c.bf16 %v324_v53, %v319_v48 }
 0x135   : > { %v1212_v9 = vmax.f32 %v1145_v63, 0.0 }
 0x136   : > { %v968_v20 = vpop.f32.mrf.mxu2 }
 0x137   : > { %1244 = vst.msk [vmem:[%s1933_s23 + $0x40] sm:$0xff] %vm710_vm0, %v1212_v9  ;;  %v969_v8 = vadd.f32 %v968_v20, %v880_v18  ;;  %v1057_v22 = vpop.f32.mrf.mxu3 }
 0x138   : > { %v882_v45 = vpop.f32.mrf.mxu1 }
 0x139   : > { %v1058_v30 = vadd.f32 %v1057_v22, %v969_v8  ;;  %v883_v33 = vadd.f32 %v882_v45, %v1830_v44 }
 0x13a   : > { %v1149_v32 = vpop.f32.mrf.mxu0 }
 0x13b   : > { %v1147_v19 = vadd.f32 %v1146_v52, %v1058_v30  ;;  %921 = vmatmul.bf16.gmra.mxu1 %v404_v24  ;;  %1010 = vmatmul.bf16.gmra.mxu2 %v405_v27  ;;  %v330_v30 = vld [vmem:[%s1628_s5 + $0x4c0] sm:$0xff] }
 0x13c   : > { %1099 = vmatmul.bf16.gmra.mxu3 %v406_v28  ;;  %v329_v28 = vld [vmem:[%s1628_s5 + $0x4b8] sm:$0xff] }
 0x13d   : > { %1490 = vmatmul.msk.bf16.gmra.mxu0 %vm710_vm0, %v407_v29  ;;  %v1213_v25 = vmax.f32 %v1147_v19, 0.0  ;;  %v334_v29 = vld [vmem:[%s1628_s5 + $0x4e0] sm:$0xff]  ;;  %v331_v19 = vld [vmem:[%s1628_s5 + $0x4c8] sm:$0xff] }
 0x13e   : > { %v971_v34 = vpop.f32.mrf.mxu2 }
 0x13f   : > { %1245 = vst.msk [vmem:[%s1933_s23 + $0x48] sm:$0xff] %vm710_vm0, %v1213_v25  ;;  %v972_v37 = vadd.f32 %v971_v34, %v883_v33  ;;  %v1060_v38 = vpop.f32.mrf.mxu3  ;;  %v336_v33 = vld [vmem:[%s1628_s5 + $0x4f0] sm:$0xff] }
 0x140   : > { %v884_v39 = vpop.f32.mrf.mxu1  ;;  %v332_v34 = vld [vmem:[%s1628_s5 + $0x4d0] sm:$0xff]  ;;  %v416_v53 = vpack.c.bf16 %v336_v33, %v331_v19 }
 0x141   : > { %v1061_v4 = vadd.f32 %v1060_v38, %v972_v37  ;;  %v885_v44 = vadd.f32 %v884_v39, %v1842_v51  ;;  %v337_v37 = vld [vmem:[%s1628_s5 + $0x4f8] sm:$0xff] }
 0x142   : > { %v1151_v55 = vpop.f32.mrf.mxu0  ;;  %v417_v56 = vpack.c.bf16 %v337_v37, %v332_v34 }
 0x143   : > { %v1150_v43 = vadd.f32 %v1149_v32, %v1061_v4  ;;  %v335_v32 = vld [vmem:[%s1628_s5 + $0x4e8] sm:$0xff] }
 0x145   : > { %v1214_v15 = vmax.f32 %v1150_v43, 0.0  ;;  %v415_v43 = vpack.c.bf16 %v335_v32, %v330_v30 }
 0x146   : > { %v973_v61 = vpop.f32.mrf.mxu2 }
 0x147   : > { %1246 = vst.msk [vmem:[%s1933_s23 + $0x50] sm:$0xff] %vm710_vm0, %v1214_v15  ;;  %v974_v52 = vadd.f32 %v973_v61, %v885_v44  ;;  %v1062_v63 = vpop.f32.mrf.mxu3 }
 0x148   : > { %v887_v5 = vpop.f32.mrf.mxu1 }
 0x149   : > { %v1063_v9 = vadd.f32 %v1062_v63, %v974_v52  ;;  %v888_v16 = vadd.f32 %v887_v5, %v1861_v7 }
 0x14a   : > { %v1154_v18 = vpop.f32.mrf.mxu0 }
 0x14b   : > { %v1152_v13 = vadd.f32 %v1151_v55, %v1063_v9  ;;  %926 = vmatmul.bf16.gmra.mxu1 %v409_v0  ;;  %1015 = vmatmul.bf16.gmra.mxu2 %v410_v1  ;;  %v414_v55 = vpack.c.bf16 %v334_v29, %v329_v28 }
 0x14c   : > { %1104 = vmatmul.bf16.gmra.mxu3 %v411_v6 }
 0x14d   : > { %1491 = vmatmul.msk.bf16.gmra.mxu0 %vm710_vm0, %v412_v42  ;;  %v1215_v51 = vmax.f32 %v1152_v13, 0.0 }
 0x14e   : > { %v976_v17 = vpop.f32.mrf.mxu2 }
 0x14f   : > { %1247 = vst.msk [vmem:[%s1933_s23 + $0x58] sm:$0xff] %vm710_vm0, %v1215_v51  ;;  %v977_v20 = vadd.f32 %v976_v17, %v888_v16  ;;  %v1065_v8 = vpop.f32.mrf.mxu3 }
 0x150   : > { %v889_v22 = vpop.f32.mrf.mxu1 }
 0x151   : > { %v1066_v24 = vadd.f32 %v1065_v8, %v977_v20  ;;  %v890_v7 = vadd.f32 %v889_v22, %v1873_v14 }
 0x152   : > { %v1156_v27 = vpop.f32.mrf.mxu0 }
 0x153   : > { %v1155_v45 = vadd.f32 %v1154_v18, %v1066_v24 }
 0x155   : > { %v1216_v25 = vmax.f32 %v1155_v45, 0.0 }
 0x156   : > { %v978_v38 = vpop.f32.mrf.mxu2 }
 0x157   : > { %1248 = vst.msk [vmem:[%s1933_s23 + $0x60] sm:$0xff] %vm710_vm0, %v1216_v25  ;;  %v979_v39 = vadd.f32 %v978_v38, %v890_v7  ;;  %v1067_v4 = vpop.f32.mrf.mxu3 }
 0x158   : > { %v892_v48 = vpop.f32.mrf.mxu1 }
 0x159   : > { %v1068_v57 = vadd.f32 %v1067_v4, %v979_v39  ;;  %v893_v44 = vadd.f32 %v892_v48, %v1892_v41 }
 0x15a   : > { %v1159_v58 = vpop.f32.mrf.mxu0 }
 0x15b   : > { %v1157_v15 = vadd.f32 %v1156_v27, %v1068_v57  ;;  %931 = vmatmul.bf16.gmra.mxu1 %v414_v55  ;;  %1020 = vmatmul.bf16.gmra.mxu2 %v415_v43 }
 0x15c   : > { %1109 = vmatmul.bf16.gmra.mxu3 %v416_v53 }
 0x15d   : > { %1492 = vmatmul.msk.bf16.gmra.mxu0 %vm710_vm0, %v417_v56  ;;  %v1217_v14 = vmax.f32 %v1157_v15, 0.0 }
 0x15e   : > { %v981_v59 = vpop.f32.mrf.mxu2 }
 0x15f   : > { %1249 = vst.msk [vmem:[%s1933_s23 + $0x68] sm:$0xff] %vm710_vm0, %v1217_v14  ;;  %v982_v60 = vadd.f32 %v981_v59, %v893_v44  ;;  %v1070_v26 = vpop.f32.mrf.mxu3 }
 0x160   : > { %v894_v61 = vpop.f32.mrf.mxu1 }
 0x161   : > { %v1071_v52 = vadd.f32 %v1070_v26, %v982_v60  ;;  %v895_v5 = vadd.f32 %v894_v61, %v1904_v54 }
 0x162   : > { %v1161_v63 = vpop.f32.mrf.mxu0 }
 0x163   : > { %v1160_v0 = vadd.f32 %v1159_v58, %v1071_v52 }
 0x165   : > { %v1218_v1 = vmax.f32 %v1160_v0, 0.0 }
 0x166   : > { %v983_v6 = vpop.f32.mrf.mxu2 }
 0x167   : > { %1250 = vst.msk [vmem:[%s1933_s23 + $0x70] sm:$0xff] %vm710_vm0, %v1218_v1  ;;  %v984_v42 = vadd.f32 %v983_v6, %v895_v5  ;;  %v1072_v9 = vpop.f32.mrf.mxu3 }
 0x168   : > { %v897_v18 = vpop.f32.mrf.mxu1 }
 0x169   : > { %v1073_v41 = vadd.f32 %v1072_v9, %v984_v42  ;;  %v898_v17 = vadd.f32 %v897_v18, %v1805_v21 }
 0x16a   : > { %v1164_v13 = vpop.f32.mrf.mxu0 }
 0x16b   : > { %v1162_v51 = vadd.f32 %v1161_v63, %v1073_v41 }
 0x16d   : > { %v1219_v16 = vmax.f32 %v1162_v51, 0.0 }
 0x16e   : > { %v986_v20 = vpop.f32.mrf.mxu2 }
 0x16f   : > { %1251 = vst.msk [vmem:[%s1933_s23 + $0x78] sm:$0xff] %vm710_vm0, %v1219_v16  ;;  %v987_v8 = vadd.f32 %v986_v20, %v898_v17  ;;  %v1075_v22 = vpop.f32.mrf.mxu3 }
 0x170   : > { %v899_v24 = vpop.f32.mrf.mxu1 }
 0x171   : > { %v1076_v54 = vadd.f32 %v1075_v22, %v987_v8  ;;  %v900_v29 = vadd.f32 %v899_v24, %v1824_v36 }
 0x172   : > { %v1166_v27 = vpop.f32.mrf.mxu0 }
 0x173   : > { %v1165_v45 = vadd.f32 %v1164_v13, %v1076_v54 }
 0x175   : > { %v1220_v28 = vmax.f32 %v1165_v45, 0.0 }
 0x176   : > { %v988_v30 = vpop.f32.mrf.mxu2 }
 0x177   : > { %1252 = vst.msk [vmem:[%s1933_s23 + $0x80] sm:$0xff] %vm710_vm0, %v1220_v28  ;;  %v989_v32 = vadd.f32 %v988_v30, %v900_v29  ;;  %v1077_v19 = vpop.f32.mrf.mxu3 }
 0x178   : > { %v902_v25 = vpop.f32.mrf.mxu1 }
 0x179   : > { %v1078_v21 = vadd.f32 %v1077_v19, %v989_v32  ;;  %v903_v37 = vadd.f32 %v902_v25, %v1836_v47 }
 0x17a   : > { %v1169_v7 = vpop.f32.mrf.mxu0 }
 0x17b   : > { %v1167_v33 = vadd.f32 %v1166_v27, %v1078_v21 }
 0x17d   : > { %v1221_v34 = vmax.f32 %v1167_v33, 0.0 }
 0x17e   : > { %v991_v38 = vpop.f32.mrf.mxu2 }
 0x17f   : > { %1253 = vst.msk [vmem:[%s1933_s23 + $0x88] sm:$0xff] %vm710_vm0, %v1221_v34  ;;  %v992_v39 = vadd.f32 %v991_v38, %v903_v37  ;;  %v1080_v4 = vpop.f32.mrf.mxu3 }
 0x180   : > { %v904_v55 = vpop.f32.mrf.mxu1 }
 0x181   : > { %v1081_v36 = vadd.f32 %v1080_v4, %v992_v39  ;;  %v905_v56 = vadd.f32 %v904_v55, %v1855_v62 }
 0x182   : > { %v1171_v43 = vpop.f32.mrf.mxu0 }
 0x183   : > { %v1170_v48 = vadd.f32 %v1169_v7, %v1081_v36 }
 0x185   : > { %v1222_v53 = vmax.f32 %v1170_v48, 0.0 }
 0x186   : > { %v993_v57 = vpop.f32.mrf.mxu2 }
 0x187   : > { %1254 = vst.msk [vmem:[%s1933_s23 + $0x90] sm:$0xff] %vm710_vm0, %v1222_v53  ;;  %v994_v58 = vadd.f32 %v993_v57, %v905_v56  ;;  %v1082_v15 = vpop.f32.mrf.mxu3 }
 0x188   : > { %v907_v14 = vpop.f32.mrf.mxu1 }
 0x189   : > { %v1083_v47 = vadd.f32 %v1082_v15, %v994_v58  ;;  %v908_v26 = vadd.f32 %v907_v14, %v1867_v10 }
 0x18a   : > { %v1174_v44 = vpop.f32.mrf.mxu0 }
 0x18b   : > { %v1172_v59 = vadd.f32 %v1171_v43, %v1083_v47 }
 0x18d   : > { %v1223_v60 = vmax.f32 %v1172_v59, 0.0 }
 0x18e   : > { %v996_v61 = vpop.f32.mrf.mxu2 }
 0x18f   : > { %1255 = vst.msk [vmem:[%s1933_s23 + $0x98] sm:$0xff] %vm710_vm0, %v1223_v60  ;;  %v997_v52 = vadd.f32 %v996_v61, %v908_v26  ;;  %v1085_v63 = vpop.f32.mrf.mxu3 }
 0x190   : > { %v909_v0 = vpop.f32.mrf.mxu1 }
 0x191   : > { %v1086_v62 = vadd.f32 %v1085_v63, %v997_v52  ;;  %v910_v42 = vadd.f32 %v909_v0, %v1886_v31 }
 0x192   : > { %v1176_v1 = vpop.f32.mrf.mxu0 }
 0x193   : > { %v1175_v5 = vadd.f32 %v1174_v44, %v1086_v62 }
 0x195   : > { %v1224_v6 = vmax.f32 %v1175_v5, 0.0 }
 0x196   : > { %v998_v9 = vpop.f32.mrf.mxu2 }
 0x197   : > { %1256 = vst.msk [vmem:[%s1933_s23 + $0xa0] sm:$0xff] %vm710_vm0, %v1224_v6  ;;  %v999_v18 = vadd.f32 %v998_v9, %v910_v42  ;;  %v1087_v41 = vpop.f32.mrf.mxu3 }
 0x198   : > { %v912_v13 = vpop.f32.mrf.mxu1 }
 0x199   : > { %v1088_v10 = vadd.f32 %v1087_v41, %v999_v18  ;;  %v913_v20 = vadd.f32 %v912_v13, %v1898_v46 }
 0x19a   : > { %v1179_v51 = vpop.f32.mrf.mxu0 }
 0x19b   : > { %v1177_v16 = vadd.f32 %v1176_v1, %v1088_v10 }
 0x19d   : > { %v1225_v17 = vmax.f32 %v1177_v16, 0.0 }
 0x19e   : > { %v1001_v8 = vpop.f32.mrf.mxu2 }
 0x19f   : > { %1257 = vst.msk [vmem:[%s1933_s23 + $0xa8] sm:$0xff] %vm710_vm0, %v1225_v17  ;;  %v1002_v22 = vadd.f32 %v1001_v8, %v913_v20  ;;  %v1090_v24 = vpop.f32.mrf.mxu3 }
 0x1a0   : > { %v914_v54 = vpop.f32.mrf.mxu1 }
 0x1a1   : > { %v1091_v31 = vadd.f32 %v1090_v24, %v1002_v22  ;;  %v915_v29 = vadd.f32 %v914_v54, %v1917_v3 }
 0x1a2   : > { %v1181_v27 = vpop.f32.mrf.mxu0 }
 0x1a3   : > { %v1180_v45 = vadd.f32 %v1179_v51, %v1091_v31 }
 0x1a5   : > { %v1226_v28 = vmax.f32 %v1180_v45, 0.0 }
 0x1a6   : > { %v1003_v30 = vpop.f32.mrf.mxu2 }
 0x1a7   : > { %1258 = vst.msk [vmem:[%s1933_s23 + $0xb0] sm:$0xff] %vm710_vm0, %v1226_v28  ;;  %v1004_v32 = vadd.f32 %v1003_v30, %v915_v29  ;;  %v1092_v19 = vpop.f32.mrf.mxu3 }
 0x1a8   : > { %v917_v25 = vpop.f32.mrf.mxu1 }
 0x1a9   : > { %v1093_v46 = vadd.f32 %v1092_v19, %v1004_v32  ;;  %v918_v34 = vadd.f32 %v917_v25, %v1808_v23 }
 0x1aa   : > { %v1184_v21 = vpop.f32.mrf.mxu0 }
 0x1ab   : > { %v1182_v7 = vadd.f32 %v1181_v27, %v1093_v46 }
 0x1ad   : > { %v1227_v33 = vmax.f32 %v1182_v7, 0.0 }
 0x1ae   : > { %v1006_v37 = vpop.f32.mrf.mxu2 }
 0x1af   : > { %1259 = vst.msk [vmem:[%s1933_s23 + $0xb8] sm:$0xff] %vm710_vm0, %v1227_v33  ;;  %v1007_v38 = vadd.f32 %v1006_v37, %v918_v34  ;;  %v1095_v39 = vpop.f32.mrf.mxu3 }
 0x1b0   : > { %v919_v4 = vpop.f32.mrf.mxu1 }
 0x1b1   : > { %v1096_v3 = vadd.f32 %v1095_v39, %v1007_v38  ;;  %v920_v48 = vadd.f32 %v919_v4, %v1827_v40 }
 0x1b2   : > { %v1186_v55 = vpop.f32.mrf.mxu0 }
 0x1b3   : > { %v1185_v36 = vadd.f32 %v1184_v21, %v1096_v3 }
 0x1b5   : > { %v1228_v43 = vmax.f32 %v1185_v36, 0.0 }
 0x1b6   : > { %v1008_v53 = vpop.f32.mrf.mxu2 }
 0x1b7   : > { %1260 = vst.msk [vmem:[%s1933_s23 + $0xc0] sm:$0xff] %vm710_vm0, %v1228_v43  ;;  %v1009_v56 = vadd.f32 %v1008_v53, %v920_v48  ;;  %v1097_v57 = vpop.f32.mrf.mxu3 }
 0x1b8   : > { %v922_v58 = vpop.f32.mrf.mxu1 }
 0x1b9   : > { %v1098_v23 = vadd.f32 %v1097_v57, %v1009_v56  ;;  %v923_v44 = vadd.f32 %v922_v58, %v1839_v49 }
 0x1ba   : > { %v1189_v15 = vpop.f32.mrf.mxu0 }
 0x1bb   : > { %v1187_v14 = vadd.f32 %v1186_v55, %v1098_v23 }
 0x1bd   : > { %v1229_v47 = vmax.f32 %v1187_v14, 0.0 }
 0x1be   : > { %v1011_v59 = vpop.f32.mrf.mxu2 }
 0x1bf   : > { %1261 = vst.msk [vmem:[%s1933_s23 + $0xc8] sm:$0xff] %vm710_vm0, %v1229_v47  ;;  %v1012_v60 = vadd.f32 %v1011_v59, %v923_v44  ;;  %v1100_v26 = vpop.f32.mrf.mxu3 }
 0x1c0   : > { %v924_v61 = vpop.f32.mrf.mxu1 }
 0x1c1   : > { %v1101_v40 = vadd.f32 %v1100_v26, %v1012_v60  ;;  %v925_v62 = vadd.f32 %v924_v61, %v1858_v2 }
 0x1c2   : > { %v1191_v52 = vpop.f32.mrf.mxu0 }
 0x1c3   : > { %v1190_v63 = vadd.f32 %v1189_v15, %v1101_v40 }
 0x1c5   : > { %v1230_v0 = vmax.f32 %v1190_v63, 0.0 }
 0x1c6   : > { %v1013_v1 = vpop.f32.mrf.mxu2 }
 0x1c7   : > { %1262 = vst.msk [vmem:[%s1933_s23 + $0xd0] sm:$0xff] %vm710_vm0, %v1230_v0  ;;  %v1014_v5 = vadd.f32 %v1013_v1, %v925_v62  ;;  %v1102_v6 = vpop.f32.mrf.mxu3 }
 0x1c8   : > { %v927_v42 = vpop.f32.mrf.mxu1 }
 0x1c9   : > { %v1103_v49 = vadd.f32 %v1102_v6, %v1014_v5  ;;  %v928_v13 = vadd.f32 %v927_v42, %v1870_v12 }
 0x1ca   : > { %v1194_v18 = vpop.f32.mrf.mxu0 }
 0x1cb   : > { %v1192_v9 = vadd.f32 %v1191_v52, %v1103_v49 }
 0x1cd   : > { %v1231_v41 = vmax.f32 %v1192_v9, 0.0 }
 0x1ce   : > { %v1016_v10 = vpop.f32.mrf.mxu2 }
 0x1cf   : > { %1263 = vst.msk [vmem:[%s1933_s23 + $0xd8] sm:$0xff] %vm710_vm0, %v1231_v41  ;;  %v1017_v51 = vadd.f32 %v1016_v10, %v928_v13  ;;  %v1105_v16 = vpop.f32.mrf.mxu3 }
 0x1d0   : > { %v929_v17 = vpop.f32.mrf.mxu1 }
 0x1d1   : > { %v1106_v2 = vadd.f32 %v1105_v16, %v1017_v51  ;;  %v930_v22 = vadd.f32 %v929_v17, %v1889_v35 }
 0x1d2   : > { %v1196_v24 = vpop.f32.mrf.mxu0 }
 0x1d3   : > { %v1195_v20 = vadd.f32 %v1194_v18, %v1106_v2 }
 0x1d5   : > { %v1232_v8 = vmax.f32 %v1195_v20, 0.0 }
 0x1d6   : > { %v1018_v54 = vpop.f32.mrf.mxu2 }
 0x1d7   : > { %1264 = vst.msk [vmem:[%s1933_s23 + $0xe0] sm:$0xff] %vm710_vm0, %v1232_v8  ;;  %v1019_v31 = vadd.f32 %v1018_v54, %v930_v22  ;;  %v1107_v27 = vpop.f32.mrf.mxu3 }
 0x1d8   : > { %v932_v45 = vpop.f32.mrf.mxu1 }
 0x1d9   : > { %v1108_v12 = vadd.f32 %v1107_v27, %v1019_v31  ;;  %v933_v30 = vadd.f32 %v932_v45, %v1901_v50 }
 0x1da   : > { %v1199_v35 = vpop.f32.mrf.mxu0 }
 0x1db   : > { %v1197_v28 = vadd.f32 %v1196_v24, %v1108_v12 }
 0x1dd   : > { %v1233_v29 = vmax.f32 %v1197_v28, 0.0 }
 0x1de   : > { %v1021_v32 = vpop.f32.mrf.mxu2 }
 0x1df   : > { %1265 = vst.msk [vmem:[%s1933_s23 + $0xe8] sm:$0xff] %vm710_vm0, %v1233_v29  ;;  %v1022_v19 = vadd.f32 %v1021_v32, %v933_v30  ;;  %v1110_v25 = vpop.f32.mrf.mxu3 }
 0x1e0   : > { %v934_v21 = vpop.f32.mrf.mxu1 }
 0x1e1   : > { %v1111_v46 = vadd.f32 %v1110_v25, %v1022_v19  ;;  %v935_v34 = vadd.f32 %v934_v21, %v1920_v11 }
 0x1e2   : > { %v1201_v50 = vpop.f32.mrf.mxu0 }
 0x1e3   : > { %v1200_v7 = vadd.f32 %v1199_v35, %v1111_v46 }
 0x1e5   : > { %v1234_v33 = vmax.f32 %v1200_v7, 0.0 }
 0x1e6   : > { %v1023_v37 = vpop.f32.mrf.mxu2 }
 0x1e7   : > { %1266 = vst.msk [vmem:[%s1933_s23 + $0xf0] sm:$0xff] %vm710_vm0, %v1234_v33  ;;  %v1024_v38 = vadd.f32 %v1023_v37, %v935_v34  ;;  %v1112_v39 = vpop.f32.mrf.mxu3 }
 0x1e9   : > { %v1113_v4 = vadd.f32 %v1112_v39, %v1024_v38 }
 0x1eb   : > { %v1202_v3 = vadd.f32 %v1201_v50, %v1113_v4 }
 0x1ed   : > { %v1235_v55 = vmax.f32 %v1202_v3, 0.0 }
 0x1ef   : > { %1267 = vst.msk [vmem:[%s1933_s23 + $0xf8] sm:$0xff] %vm710_vm0, %v1235_v55 }
 0x1f0 PF: > { %s13_s12 = sadd.s32 1, %s1571_s12  }
 0x1f1   : > { %p10_p4 = scmp.ge.s32.totalorder %s13_s12, 5  }
 0x1f3   :  { %12 = sbr.rel (!%p10_p4) target bundleno = 1 (0x1), region = 62 }

</bundles_post_ra>
